<compile_context>
chip_gen: v7x
topology: tpu7x:2x2x1
jax: 0.10.0
libtpu: 0.0.40
codegen_flags: <defaults>
</compile_context>

<pallas_src>
import functools

import jax
import jax.numpy as jnp
from jax import lax
from jax.experimental import pallas as pl
from jax.experimental.pallas import tpu as pltpu


# ---------------------------------------------------------------------------
# Fused kernel: 2-layer LSTM recurrence + Linear/ReLU/LogSoftmax head,
# gridded over chunks of CH timesteps (state carried in VMEM scratch).
# ---------------------------------------------------------------------------
def fused_kernel(xproj_ref,   # (CH, 4H) f32  chunk of emb@wih0+b0 (layer-0 input proj)
                 whh0_ref,    # (H, 4H)  bf16 layer-0 hidden weights (pre-transposed)
                 wcat1_ref,   # (2H, 4H) bf16 layer-1 [w_ih ; w_hh] row-concatenated
                 b1_ref,      # (1, 4H)  f32  layer-1 folded bias (b_ih + b_hh)
                 wlin_ref,    # (H, Vp)  bf16 head weights (vocab padded to 128)
                 blin_ref,    # (1, Vp)  f32  head bias (padded)
                 out_ref,     # (CH, Vp) f32  OUTPUT: log-probs for this chunk
                 h0_ref, c0_ref, h1_ref, c1_ref,   # (1, H) f32 scratch: carried state
                 *, v_true, chunk):
    H = whh0_ref.shape[0]

    # Zero-init the carried LSTM state on the first chunk (matches PyTorch's
    # default zero initial (h, c)).
    @pl.when(pl.program_id(0) == 0)
    def _():
        h0_ref[...] = jnp.zeros_like(h0_ref)
        c0_ref[...] = jnp.zeros_like(c0_ref)
        h1_ref[...] = jnp.zeros_like(h1_ref)
        c1_ref[...] = jnp.zeros_like(c1_ref)

    # Weights/biases loaded from VMEM once per chunk; resident in vregs below.
    whh0 = whh0_ref[...]
    wcat1 = wcat1_ref[...]
    b1 = b1_ref[...]

    def cell(gates, c):
        # One full-width sigmoid + one full-width tanh over (1, 4H), then static
        # slices (PyTorch gate order [i, f, g, o]).  f32 gate math.
        sig = jax.nn.sigmoid(gates)
        th = jnp.tanh(gates)
        i = sig[:, 0 * H:1 * H]
        f = sig[:, 1 * H:2 * H]
        g = th[:, 2 * H:3 * H]
        o = sig[:, 3 * H:4 * H]
        c_new = f * c + i * g
        h_new = o * jnp.tanh(c_new)
        return h_new, c_new

    # Pull carried state into vregs for the chunk.
    h0 = h0_ref[...]
    c0 = c0_ref[...]
    h1 = h1_ref[...]
    c1 = c1_ref[...]

    rows = []
    for t in range(chunk):  # static unroll; CH is small so vreg pressure is bounded
        xp = xproj_ref[pl.ds(t, 1), :]                       # (1, 4H) f32, static slice
        # Layer 0: only the hidden matvec is on the recurrence path (input
        # projection was fused into the embedding lookup).  bf16 MXU operands.
        gates0 = xp + jnp.dot(h0.astype(jnp.bfloat16), whh0,
                              preferred_element_type=jnp.float32)
        h0, c0 = cell(gates0, c0)
        # Layer 1: single fused matvec [h0_new ; h1] @ [w_ih1 ; w_hh1].
        hin1 = jnp.concatenate([h0, h1], axis=-1).astype(jnp.bfloat16)   # (1, 2H)
        gates1 = jnp.dot(hin1, wcat1, preferred_element_type=jnp.float32) + b1
        h1, c1 = cell(gates1, c1)
        rows.append(h1)

    # Write carried state back once per chunk.
    h0_ref[...] = h0
    c0_ref[...] = c0
    h1_ref[...] = h1
    c1_ref[...] = c1

    # Head on the finished chunk: dense (CH, H) x (H, Vp) MXU matmul, ReLU,
    # padded-lane mask, f32 logsumexp.  Output block is sublane/lane dense.
    h_chunk = jnp.concatenate(rows, axis=0)                  # (CH, H) f32
    logits = (jnp.dot(h_chunk.astype(jnp.bfloat16), wlin_ref[...],
                      preferred_element_type=jnp.float32)
              + blin_ref[...])                               # (CH, Vp) f32
    relu = jnp.maximum(logits, 0.0)
    vp = out_ref.shape[-1]
    if vp > v_true:
        # Mask padded vocab lanes; safe because ReLU guarantees row max >= 0 and
        # exp(-1e30 - m) underflows to 0 in the sum.
        col = lax.broadcasted_iota(jnp.int32, relu.shape, 1)
        relu = jnp.where(col < v_true, relu, jnp.float32(-1e30))
    m = jnp.max(relu, axis=-1, keepdims=True)
    lse = jnp.log(jnp.sum(jnp.exp(relu - m), axis=-1, keepdims=True)) + m
    out_ref[...] = relu - lse


# ---------------------------------------------------------------------------
# Wrapper
# ---------------------------------------------------------------------------
@jax.jit
def poetry_forward(token_ids, params):
    """token_ids: (seq,) int32. Returns (seq, dic_len) float32 log-probs."""
    emb = params["embedding"]                 # (V, E)
    wih0, whh0, b0 = params["wih0"], params["whh0"], params["b0"]
    wih1, whh1, b1 = params["wih1"], params["whh1"], params["b1"]
    wlin, blin = params["wlin"], params["blin"]

    seq = token_ids.shape[0]
    H = whh0.shape[0]                         # hidden_dim (whh0 is (H, 4H))
    V = wlin.shape[1]                         # dic_len

    # Algebraic fusion of embedding + layer-0 input projection (exact):
    #   xproj[t] = emb[ids[t]] @ wih0 + b0  ==  (emb @ wih0 + b0)[ids[t]]
    # In real inference T is cached across calls; here it is one (V,E)x(E,4H)
    # f32 matmul in XLA replacing a (seq,E) gather + in-kernel (seq,E)x(E,4H).
    t_proj = jnp.dot(emb, wih0, preferred_element_type=jnp.float32) + b0   # (V, 4H)
    xproj = jnp.take(t_proj, token_ids, axis=0)                            # (seq, 4H)

    # bf16 MXU operands (accumulation stays f32 inside the kernel).
    whh0_bf = whh0.astype(jnp.bfloat16)
    wcat1 = jnp.concatenate([wih1, whh1], axis=0).astype(jnp.bfloat16)     # (2H, 4H)

    # Pad vocab to a lane-dense multiple of 128.
    Vp = ((V + 127) // 128) * 128
    wlin_p = jnp.pad(wlin, ((0, 0), (0, Vp - V))).astype(jnp.bfloat16)     # (H, Vp)
    blin_p = jnp.pad(blin, ((0, 0), (0, Vp - V)))                          # (1, Vp)

    # Chunk the sequence: 8 timesteps per grid step (sublane-dense blocks,
    # bounded vreg pressure, one dense head matmul + one dense store per chunk).
    CH = 8
    seq_p = ((seq + CH - 1) // CH) * CH
    if seq_p != seq:
        # Padded trailing timesteps run with zero input and are sliced off below.
        xproj = jnp.pad(xproj, ((0, seq_p - seq), (0, 0)))

    out_p = pl.pallas_call(
        functools.partial(fused_kernel, v_true=V, chunk=CH),
        out_shape=jax.ShapeDtypeStruct((seq_p, Vp), jnp.float32),
        grid=(seq_p // CH,),
        in_specs=[
            pl.BlockSpec((CH, 4 * H), lambda i: (i, 0)),       # xproj chunk (pipelined)
            pl.BlockSpec((H, 4 * H), lambda i: (0, 0)),        # whh0 (resident)
            pl.BlockSpec((2 * H, 4 * H), lambda i: (0, 0)),    # wcat1 (resident)
            pl.BlockSpec((1, 4 * H), lambda i: (0, 0)),        # b1 (resident)
            pl.BlockSpec((H, Vp), lambda i: (0, 0)),           # wlin (resident)
            pl.BlockSpec((1, Vp), lambda i: (0, 0)),           # blin (resident)
        ],
        out_specs=pl.BlockSpec((CH, Vp), lambda i: (i, 0)),
        scratch_shapes=[pltpu.VMEM((1, H), jnp.float32)] * 4,  # h0, c0, h1, c1 carried
        compiler_params=pltpu.CompilerParams(
            # Sequential recurrence: state is carried across grid steps.
            dimension_semantics=("arbitrary",)),
    )(xproj, whh0_bf, wcat1, b1, wlin_p, blin_p)

    return out_p[:seq, :V]


# ---------------------------------------------------------------------------
# Pure-JAX f32 reference (for correctness checking against the kernel)
# ---------------------------------------------------------------------------
def poetry_forward_ref(token_ids, params):
    x = jnp.take(params["embedding"], token_ids, axis=0)       # (seq, E)

    def lstm_layer(x_seq, wih, whh, b):
        H = whh.shape[0]

        def step(carry, xt):
            h, c = carry
            gates = xt @ wih + h @ whh + b[0]
            i = jax.nn.sigmoid(gates[0 * H:1 * H])
            f = jax.nn.sigmoid(gates[1 * H:2 * H])
            g = jnp.tanh(gates[2 * H:3 * H])
            o = jax.nn.sigmoid(gates[3 * H:4 * H])
            c = f * c + i * g
            h = o * jnp.tanh(c)
            return (h, c), h

        init = (jnp.zeros((H,), jnp.float32), jnp.zeros((H,), jnp.float32))
        _, hs = lax.scan(step, init, x_seq)
        return hs

    h1 = lstm_layer(x, params["wih0"], params["whh0"], params["b0"])
    h2 = lstm_layer(h1, params["wih1"], params["whh1"], params["b1"])
    logits = h2 @ params["wlin"] + params["blin"][0]
    return jax.nn.log_softmax(jnp.maximum(logits, 0.0), axis=-1)


# ---------------------------------------------------------------------------
# Deterministic synthetic parameters (xavier-normal for LSTM ih/hh, as in module)
# ---------------------------------------------------------------------------
def init_params(key, dic_len, embed_dim, hidden_dim):
    ks = jax.random.split(key, 12)

    def xavier(k, shape):
        fan_out, fan_in = shape
        std = (2.0 / (fan_in + fan_out)) ** 0.5
        return std * jax.random.normal(k, shape, jnp.float32)

    H4 = 4 * hidden_dim
    # PyTorch stores weight_ih_l* as (4H, in); pre-transpose to (in, 4H).
    wih0 = xavier(ks[0], (H4, embed_dim)).T
    whh0 = xavier(ks[1], (H4, hidden_dim)).T
    wih1 = xavier(ks[2], (H4, hidden_dim)).T
    whh1 = xavier(ks[3], (H4, hidden_dim)).T
    bscale = 1.0 / (hidden_dim ** 0.5)
    b0 = (jax.random.uniform(ks[4], (1, H4), jnp.float32, -bscale, bscale)
          + jax.random.uniform(ks[5], (1, H4), jnp.float32, -bscale, bscale))
    b1 = (jax.random.uniform(ks[6], (1, H4), jnp.float32, -bscale, bscale)
          + jax.random.uniform(ks[7], (1, H4), jnp.float32, -bscale, bscale))
    lscale = 1.0 / (hidden_dim ** 0.5)
    wlin = jax.random.uniform(ks[8], (dic_len, hidden_dim), jnp.float32,
                              -lscale, lscale).T
    blin = jax.random.uniform(ks[9], (1, dic_len), jnp.float32, -lscale, lscale)
    embedding = jax.random.normal(ks[10], (dic_len, embed_dim), jnp.float32)
    return {
        "embedding": embedding,
        "wih0": wih0, "whh0": whh0, "b0": b0,
        "wih1": wih1, "whh1": whh1, "b1": b1,
        "wlin": wlin, "blin": blin,
    }


if __name__ == "__main__":
    # Small shapes consistent with the module (embed_dim=256 is hard-coded by view()).
    dic_len, embed_dim, hidden_dim, seq = 64, 256, 32, 8

    key = jax.random.PRNGKey(0)
    kp, kx = jax.random.split(key)
    params = init_params(kp, dic_len, embed_dim, hidden_dim)
    token_ids = jax.random.randint(kx, (seq,), 0, dic_len, dtype=jnp.int32)

    out = poetry_forward(token_ids, params)
    out = jax.block_until_ready(out)

    assert out.shape == (seq, dic_len)
    assert out.dtype == jnp.float32
    # log-softmax rows should sum to ~1 in probability space
    assert bool(jnp.all(jnp.abs(jnp.sum(jnp.exp(out), axis=-1) - 1.0) < 1e-4))
    # Compare against the pure-JAX f32 reference (bf16 MXU operands -> ~1e-3
    # level logit differences, comfortably within this tolerance).
    ref = poetry_forward_ref(token_ids, params)
    assert bool(jnp.allclose(out, ref, atol=5e-2, rtol=5e-2))
    print("KERNEL_OK")
</pallas_src>

<mosaic_0001>
module attributes {stable_mosaic.version = 11 : i64} {
  func.func @fused_kernel(%arg0: i32, %arg1: memref<8x128xf32, #tpu.memory_space<vmem>>, %arg2: memref<32x128xbf16, #tpu.memory_space<vmem>>, %arg3: memref<64x128xbf16, #tpu.memory_space<vmem>>, %arg4: memref<1x128xf32, #tpu.memory_space<vmem>>, %arg5: memref<32x128xbf16, #tpu.memory_space<vmem>>, %arg6: memref<1x128xf32, #tpu.memory_space<vmem>>, %arg7: memref<8x128xf32, #tpu.memory_space<vmem>>, %arg8: memref<1x32xf32, #tpu.memory_space<vmem>>, %arg9: memref<1x32xf32, #tpu.memory_space<vmem>>, %arg10: memref<1x32xf32, #tpu.memory_space<vmem>>, %arg11: memref<1x32xf32, #tpu.memory_space<vmem>>) attributes {dimension_semantics = [#tpu.dimension_semantics<arbitrary>], iteration_bounds = array<i64: 1>, scalar_prefetch = 0 : i64, scratch_operands = 4 : i64, tpu.core_type = #tpu.core_type<tc>, window_params = [{transform_indices = @transform_0, window_bounds = array<i64: 8, 128>}, {pipeline_mode = #tpu.pipeline_mode<synchronous>, transform_indices = @transform_1, window_bounds = array<i64: 32, 128>}, {pipeline_mode = #tpu.pipeline_mode<synchronous>, transform_indices = @transform_2, window_bounds = array<i64: 64, 128>}, {pipeline_mode = #tpu.pipeline_mode<synchronous>, transform_indices = @transform_3, window_bounds = array<i64: 1, 128>}, {pipeline_mode = #tpu.pipeline_mode<synchronous>, transform_indices = @transform_4, window_bounds = array<i64: 32, 128>}, {pipeline_mode = #tpu.pipeline_mode<synchronous>, transform_indices = @transform_5, window_bounds = array<i64: 1, 128>}, {transform_indices = @transform_6, window_bounds = array<i64: 8, 128>}]} {
    %c0_i32 = arith.constant 0 : i32
    %0 = arith.cmpi eq, %arg0, %c0_i32 : i32
    %1 = arith.extui %0 : i1 to i32
    %c0_i32_0 = arith.constant 0 : i32
    %2 = arith.cmpi ne, %1, %c0_i32_0 : i32
    scf.if %2 {
      %cst_73 = arith.constant 0.000000e+00 : f32
      %344 = vector.broadcast %cst_73 : f32 to vector<1x32xf32>
      %c0_74 = arith.constant 0 : index
      %c0_75 = arith.constant 0 : index
      %345 = vector.load %arg8[%c0_74, %c0_75] : memref<1x32xf32, #tpu.memory_space<vmem>>, vector<1x32xf32>
      tpu.vector_store %arg8[%c0_74, %c0_75], %344 {strides = array<i32>} : memref<1x32xf32, #tpu.memory_space<vmem>>, vector<1x32xf32>,
      %cst_76 = arith.constant 0.000000e+00 : f32
      %346 = vector.broadcast %cst_76 : f32 to vector<1x32xf32>
      %c0_77 = arith.constant 0 : index
      %c0_78 = arith.constant 0 : index
      %347 = vector.load %arg9[%c0_77, %c0_78] : memref<1x32xf32, #tpu.memory_space<vmem>>, vector<1x32xf32>
      tpu.vector_store %arg9[%c0_77, %c0_78], %346 {strides = array<i32>} : memref<1x32xf32, #tpu.memory_space<vmem>>, vector<1x32xf32>,
      %cst_79 = arith.constant 0.000000e+00 : f32
      %348 = vector.broadcast %cst_79 : f32 to vector<1x32xf32>
      %c0_80 = arith.constant 0 : index
      %c0_81 = arith.constant 0 : index
      %349 = vector.load %arg10[%c0_80, %c0_81] : memref<1x32xf32, #tpu.memory_space<vmem>>, vector<1x32xf32>
      tpu.vector_store %arg10[%c0_80, %c0_81], %348 {strides = array<i32>} : memref<1x32xf32, #tpu.memory_space<vmem>>, vector<1x32xf32>,
      %cst_82 = arith.constant 0.000000e+00 : f32
      %350 = vector.broadcast %cst_82 : f32 to vector<1x32xf32>
      %c0_83 = arith.constant 0 : index
      %c0_84 = arith.constant 0 : index
      %351 = vector.load %arg11[%c0_83, %c0_84] : memref<1x32xf32, #tpu.memory_space<vmem>>, vector<1x32xf32>
      tpu.vector_store %arg11[%c0_83, %c0_84], %350 {strides = array<i32>} : memref<1x32xf32, #tpu.memory_space<vmem>>, vector<1x32xf32>,
    } else {
    }
    %c0 = arith.constant 0 : index
    %c0_1 = arith.constant 0 : index
    %3 = vector.load %arg2[%c0, %c0_1] : memref<32x128xbf16, #tpu.memory_space<vmem>>, vector<32x128xbf16>
    %c0_2 = arith.constant 0 : index
    %c0_3 = arith.constant 0 : index
    %4 = vector.load %arg3[%c0_2, %c0_3] : memref<64x128xbf16, #tpu.memory_space<vmem>>, vector<64x128xbf16>
    %c0_4 = arith.constant 0 : index
    %c0_5 = arith.constant 0 : index
    %5 = vector.load %arg4[%c0_4, %c0_5] : memref<1x128xf32, #tpu.memory_space<vmem>>, vector<1x128xf32>
    %c0_6 = arith.constant 0 : index
    %c0_7 = arith.constant 0 : index
    %6 = vector.load %arg8[%c0_6, %c0_7] : memref<1x32xf32, #tpu.memory_space<vmem>>, vector<1x32xf32>
    %c0_8 = arith.constant 0 : index
    %c0_9 = arith.constant 0 : index
    %7 = vector.load %arg9[%c0_8, %c0_9] : memref<1x32xf32, #tpu.memory_space<vmem>>, vector<1x32xf32>
    %c0_10 = arith.constant 0 : index
    %c0_11 = arith.constant 0 : index
    %8 = vector.load %arg10[%c0_10, %c0_11] : memref<1x32xf32, #tpu.memory_space<vmem>>, vector<1x32xf32>
    %c0_12 = arith.constant 0 : index
    %c0_13 = arith.constant 0 : index
    %9 = vector.load %arg11[%c0_12, %c0_13] : memref<1x32xf32, #tpu.memory_space<vmem>>, vector<1x32xf32>
    %c0_14 = arith.constant 0 : index
    %c0_15 = arith.constant 0 : index
    %10 = vector.load %arg1[%c0_14, %c0_15] : memref<8x128xf32, #tpu.memory_space<vmem>>, vector<1x128xf32>
    %11 = arith.truncf %6 : vector<1x32xf32> to vector<1x32xbf16>
    %cst = arith.constant dense<0.000000e+00> : vector<1x128xf32>
    %12 = tpu.matmul %11, %3, %cst {dimension_numbers = #tpu.dot_dimension_numbers<[1], [0], [0], [1], [0, 0, 1, 1], [], []>} : vector<1x32xbf16>, vector<32x128xbf16>, vector<1x128xf32> -> vector<1x128xf32>
    %13 = arith.addf %10, %12 : vector<1x128xf32>
    %14 = arith.negf %13 : vector<1x128xf32>
    %15 = math.exp %14 : vector<1x128xf32>
    %cst_16 = arith.constant 1.000000e+00 : f32
    %16 = vector.broadcast %cst_16 : f32 to vector<1x128xf32>
    %17 = arith.addf %16, %15 : vector<1x128xf32>
    %18 = arith.divf %16, %17 : vector<1x128xf32>
    %19 = math.tanh %13 : vector<1x128xf32>
    %20 = vector.extract_strided_slice %18 {offsets = [0, 0], sizes = [1, 32], strides = [1, 1]} : vector<1x128xf32> to vector<1x32xf32>
    %21 = vector.extract_strided_slice %18 {offsets = [0, 32], sizes = [1, 32], strides = [1, 1]} : vector<1x128xf32> to vector<1x32xf32>
    %22 = vector.extract_strided_slice %19 {offsets = [0, 64], sizes = [1, 32], strides = [1, 1]} : vector<1x128xf32> to vector<1x32xf32>
    %23 = vector.extract_strided_slice %18 {offsets = [0, 96], sizes = [1, 32], strides = [1, 1]} : vector<1x128xf32> to vector<1x32xf32>
    %24 = arith.mulf %21, %7 : vector<1x32xf32>
    %25 = arith.mulf %20, %22 : vector<1x32xf32>
    %26 = arith.addf %24, %25 : vector<1x32xf32>
    %27 = math.tanh %26 : vector<1x32xf32>
    %28 = arith.mulf %23, %27 : vector<1x32xf32>
    %29 = tpu.concatenate %28, %8 in 1 : vector<1x32xf32>, vector<1x32xf32> -> vector<1x64xf32>
    %30 = arith.truncf %29 : vector<1x64xf32> to vector<1x64xbf16>
    %cst_17 = arith.constant dense<0.000000e+00> : vector<1x128xf32>
    %31 = tpu.matmul %30, %4, %cst_17 {dimension_numbers = #tpu.dot_dimension_numbers<[1], [0], [0], [1], [0, 0, 1, 1], [], []>} : vector<1x64xbf16>, vector<64x128xbf16>, vector<1x128xf32> -> vector<1x128xf32>
    %32 = arith.addf %31, %5 : vector<1x128xf32>
    %33 = arith.negf %32 : vector<1x128xf32>
    %34 = math.exp %33 : vector<1x128xf32>
    %cst_18 = arith.constant 1.000000e+00 : f32
    %35 = vector.broadcast %cst_18 : f32 to vector<1x128xf32>
    %36 = arith.addf %35, %34 : vector<1x128xf32>
    %37 = arith.divf %35, %36 : vector<1x128xf32>
    %38 = math.tanh %32 : vector<1x128xf32>
    %39 = vector.extract_strided_slice %37 {offsets = [0, 0], sizes = [1, 32], strides = [1, 1]} : vector<1x128xf32> to vector<1x32xf32>
    %40 = vector.extract_strided_slice %37 {offsets = [0, 32], sizes = [1, 32], strides = [1, 1]} : vector<1x128xf32> to vector<1x32xf32>
    %41 = vector.extract_strided_slice %38 {offsets = [0, 64], sizes = [1, 32], strides = [1, 1]} : vector<1x128xf32> to vector<1x32xf32>
    %42 = vector.extract_strided_slice %37 {offsets = [0, 96], sizes = [1, 32], strides = [1, 1]} : vector<1x128xf32> to vector<1x32xf32>
    %43 = arith.mulf %40, %9 : vector<1x32xf32>
    %44 = arith.mulf %39, %41 : vector<1x32xf32>
    %45 = arith.addf %43, %44 : vector<1x32xf32>
    %46 = math.tanh %45 : vector<1x32xf32>
    %47 = arith.mulf %42, %46 : vector<1x32xf32>
    %c1 = arith.constant 1 : index
    %c0_19 = arith.constant 0 : index
    %48 = vector.load %arg1[%c1, %c0_19] : memref<8x128xf32, #tpu.memory_space<vmem>>, vector<1x128xf32>
    %49 = arith.truncf %28 : vector<1x32xf32> to vector<1x32xbf16>
    %cst_20 = arith.constant dense<0.000000e+00> : vector<1x128xf32>
    %50 = tpu.matmul %49, %3, %cst_20 {dimension_numbers = #tpu.dot_dimension_numbers<[1], [0], [0], [1], [0, 0, 1, 1], [], []>} : vector<1x32xbf16>, vector<32x128xbf16>, vector<1x128xf32> -> vector<1x128xf32>
    %51 = arith.addf %48, %50 : vector<1x128xf32>
    %52 = arith.negf %51 : vector<1x128xf32>
    %53 = math.exp %52 : vector<1x128xf32>
    %cst_21 = arith.constant 1.000000e+00 : f32
    %54 = vector.broadcast %cst_21 : f32 to vector<1x128xf32>
    %55 = arith.addf %54, %53 : vector<1x128xf32>
    %56 = arith.divf %54, %55 : vector<1x128xf32>
    %57 = math.tanh %51 : vector<1x128xf32>
    %58 = vector.extract_strided_slice %56 {offsets = [0, 0], sizes = [1, 32], strides = [1, 1]} : vector<1x128xf32> to vector<1x32xf32>
    %59 = vector.extract_strided_slice %56 {offsets = [0, 32], sizes = [1, 32], strides = [1, 1]} : vector<1x128xf32> to vector<1x32xf32>
    %60 = vector.extract_strided_slice %57 {offsets = [0, 64], sizes = [1, 32], strides = [1, 1]} : vector<1x128xf32> to vector<1x32xf32>
    %61 = vector.extract_strided_slice %56 {offsets = [0, 96], sizes = [1, 32], strides = [1, 1]} : vector<1x128xf32> to vector<1x32xf32>
    %62 = arith.mulf %59, %26 : vector<1x32xf32>
    %63 = arith.mulf %58, %60 : vector<1x32xf32>
    %64 = arith.addf %62, %63 : vector<1x32xf32>
    %65 = math.tanh %64 : vector<1x32xf32>
    %66 = arith.mulf %61, %65 : vector<1x32xf32>
    %67 = tpu.concatenate %66, %47 in 1 : vector<1x32xf32>, vector<1x32xf32> -> vector<1x64xf32>
    %68 = arith.truncf %67 : vector<1x64xf32> to vector<1x64xbf16>
    %cst_22 = arith.constant dense<0.000000e+00> : vector<1x128xf32>
    %69 = tpu.matmul %68, %4, %cst_22 {dimension_numbers = #tpu.dot_dimension_numbers<[1], [0], [0], [1], [0, 0, 1, 1], [], []>} : vector<1x64xbf16>, vector<64x128xbf16>, vector<1x128xf32> -> vector<1x128xf32>
    %70 = arith.addf %69, %5 : vector<1x128xf32>
    %71 = arith.negf %70 : vector<1x128xf32>
    %72 = math.exp %71 : vector<1x128xf32>
    %cst_23 = arith.constant 1.000000e+00 : f32
    %73 = vector.broadcast %cst_23 : f32 to vector<1x128xf32>
    %74 = arith.addf %73, %72 : vector<1x128xf32>
    %75 = arith.divf %73, %74 : vector<1x128xf32>
    %76 = math.tanh %70 : vector<1x128xf32>
    %77 = vector.extract_strided_slice %75 {offsets = [0, 0], sizes = [1, 32], strides = [1, 1]} : vector<1x128xf32> to vector<1x32xf32>
    %78 = vector.extract_strided_slice %75 {offsets = [0, 32], sizes = [1, 32], strides = [1, 1]} : vector<1x128xf32> to vector<1x32xf32>
    %79 = vector.extract_strided_slice %76 {offsets = [0, 64], sizes = [1, 32], strides = [1, 1]} : vector<1x128xf32> to vector<1x32xf32>
    %80 = vector.extract_strided_slice %75 {offsets = [0, 96], sizes = [1, 32], strides = [1, 1]} : vector<1x128xf32> to vector<1x32xf32>
    %81 = arith.mulf %78, %45 : vector<1x32xf32>
    %82 = arith.mulf %77, %79 : vector<1x32xf32>
    %83 = arith.addf %81, %82 : vector<1x32xf32>
    %84 = math.tanh %83 : vector<1x32xf32>
    %85 = arith.mulf %80, %84 : vector<1x32xf32>
    %c2 = arith.constant 2 : index
    %c0_24 = arith.constant 0 : index
    %86 = vector.load %arg1[%c2, %c0_24] : memref<8x128xf32, #tpu.memory_space<vmem>>, vector<1x128xf32>
    %87 = arith.truncf %66 : vector<1x32xf32> to vector<1x32xbf16>
    %cst_25 = arith.constant dense<0.000000e+00> : vector<1x128xf32>
    %88 = tpu.matmul %87, %3, %cst_25 {dimension_numbers = #tpu.dot_dimension_numbers<[1], [0], [0], [1], [0, 0, 1, 1], [], []>} : vector<1x32xbf16>, vector<32x128xbf16>, vector<1x128xf32> -> vector<1x128xf32>
    %89 = arith.addf %86, %88 : vector<1x128xf32>
    %90 = arith.negf %89 : vector<1x128xf32>
    %91 = math.exp %90 : vector<1x128xf32>
    %cst_26 = arith.constant 1.000000e+00 : f32
    %92 = vector.broadcast %cst_26 : f32 to vector<1x128xf32>
    %93 = arith.addf %92, %91 : vector<1x128xf32>
    %94 = arith.divf %92, %93 : vector<1x128xf32>
    %95 = math.tanh %89 : vector<1x128xf32>
    %96 = vector.extract_strided_slice %94 {offsets = [0, 0], sizes = [1, 32], strides = [1, 1]} : vector<1x128xf32> to vector<1x32xf32>
    %97 = vector.extract_strided_slice %94 {offsets = [0, 32], sizes = [1, 32], strides = [1, 1]} : vector<1x128xf32> to vector<1x32xf32>
    %98 = vector.extract_strided_slice %95 {offsets = [0, 64], sizes = [1, 32], strides = [1, 1]} : vector<1x128xf32> to vector<1x32xf32>
    %99 = vector.extract_strided_slice %94 {offsets = [0, 96], sizes = [1, 32], strides = [1, 1]} : vector<1x128xf32> to vector<1x32xf32>
    %100 = arith.mulf %97, %64 : vector<1x32xf32>
    %101 = arith.mulf %96, %98 : vector<1x32xf32>
    %102 = arith.addf %100, %101 : vector<1x32xf32>
    %103 = math.tanh %102 : vector<1x32xf32>
    %104 = arith.mulf %99, %103 : vector<1x32xf32>
    %105 = tpu.concatenate %104, %85 in 1 : vector<1x32xf32>, vector<1x32xf32> -> vector<1x64xf32>
    %106 = arith.truncf %105 : vector<1x64xf32> to vector<1x64xbf16>
    %cst_27 = arith.constant dense<0.000000e+00> : vector<1x128xf32>
    %107 = tpu.matmul %106, %4, %cst_27 {dimension_numbers = #tpu.dot_dimension_numbers<[1], [0], [0], [1], [0, 0, 1, 1], [], []>} : vector<1x64xbf16>, vector<64x128xbf16>, vector<1x128xf32> -> vector<1x128xf32>
    %108 = arith.addf %107, %5 : vector<1x128xf32>
    %109 = arith.negf %108 : vector<1x128xf32>
    %110 = math.exp %109 : vector<1x128xf32>
    %cst_28 = arith.constant 1.000000e+00 : f32
    %111 = vector.broadcast %cst_28 : f32 to vector<1x128xf32>
    %112 = arith.addf %111, %110 : vector<1x128xf32>
    %113 = arith.divf %111, %112 : vector<1x128xf32>
    %114 = math.tanh %108 : vector<1x128xf32>
    %115 = vector.extract_strided_slice %113 {offsets = [0, 0], sizes = [1, 32], strides = [1, 1]} : vector<1x128xf32> to vector<1x32xf32>
    %116 = vector.extract_strided_slice %113 {offsets = [0, 32], sizes = [1, 32], strides = [1, 1]} : vector<1x128xf32> to vector<1x32xf32>
    %117 = vector.extract_strided_slice %114 {offsets = [0, 64], sizes = [1, 32], strides = [1, 1]} : vector<1x128xf32> to vector<1x32xf32>
    %118 = vector.extract_strided_slice %113 {offsets = [0, 96], sizes = [1, 32], strides = [1, 1]} : vector<1x128xf32> to vector<1x32xf32>
    %119 = arith.mulf %116, %83 : vector<1x32xf32>
    %120 = arith.mulf %115, %117 : vector<1x32xf32>
    %121 = arith.addf %119, %120 : vector<1x32xf32>
    %122 = math.tanh %121 : vector<1x32xf32>
    %123 = arith.mulf %118, %122 : vector<1x32xf32>
    %c3 = arith.constant 3 : index
    %c0_29 = arith.constant 0 : index
    %124 = vector.load %arg1[%c3, %c0_29] : memref<8x128xf32, #tpu.memory_space<vmem>>, vector<1x128xf32>
    %125 = arith.truncf %104 : vector<1x32xf32> to vector<1x32xbf16>
    %cst_30 = arith.constant dense<0.000000e+00> : vector<1x128xf32>
    %126 = tpu.matmul %125, %3, %cst_30 {dimension_numbers = #tpu.dot_dimension_numbers<[1], [0], [0], [1], [0, 0, 1, 1], [], []>} : vector<1x32xbf16>, vector<32x128xbf16>, vector<1x128xf32> -> vector<1x128xf32>
    %127 = arith.addf %124, %126 : vector<1x128xf32>
    %128 = arith.negf %127 : vector<1x128xf32>
    %129 = math.exp %128 : vector<1x128xf32>
    %cst_31 = arith.constant 1.000000e+00 : f32
    %130 = vector.broadcast %cst_31 : f32 to vector<1x128xf32>
    %131 = arith.addf %130, %129 : vector<1x128xf32>
    %132 = arith.divf %130, %131 : vector<1x128xf32>
    %133 = math.tanh %127 : vector<1x128xf32>
    %134 = vector.extract_strided_slice %132 {offsets = [0, 0], sizes = [1, 32], strides = [1, 1]} : vector<1x128xf32> to vector<1x32xf32>
    %135 = vector.extract_strided_slice %132 {offsets = [0, 32], sizes = [1, 32], strides = [1, 1]} : vector<1x128xf32> to vector<1x32xf32>
    %136 = vector.extract_strided_slice %133 {offsets = [0, 64], sizes = [1, 32], strides = [1, 1]} : vector<1x128xf32> to vector<1x32xf32>
    %137 = vector.extract_strided_slice %132 {offsets = [0, 96], sizes = [1, 32], strides = [1, 1]} : vector<1x128xf32> to vector<1x32xf32>
    %138 = arith.mulf %135, %102 : vector<1x32xf32>
    %139 = arith.mulf %134, %136 : vector<1x32xf32>
    %140 = arith.addf %138, %139 : vector<1x32xf32>
    %141 = math.tanh %140 : vector<1x32xf32>
    %142 = arith.mulf %137, %141 : vector<1x32xf32>
    %143 = tpu.concatenate %142, %123 in 1 : vector<1x32xf32>, vector<1x32xf32> -> vector<1x64xf32>
    %144 = arith.truncf %143 : vector<1x64xf32> to vector<1x64xbf16>
    %cst_32 = arith.constant dense<0.000000e+00> : vector<1x128xf32>
    %145 = tpu.matmul %144, %4, %cst_32 {dimension_numbers = #tpu.dot_dimension_numbers<[1], [0], [0], [1], [0, 0, 1, 1], [], []>} : vector<1x64xbf16>, vector<64x128xbf16>, vector<1x128xf32> -> vector<1x128xf32>
    %146 = arith.addf %145, %5 : vector<1x128xf32>
    %147 = arith.negf %146 : vector<1x128xf32>
    %148 = math.exp %147 : vector<1x128xf32>
    %cst_33 = arith.constant 1.000000e+00 : f32
    %149 = vector.broadcast %cst_33 : f32 to vector<1x128xf32>
    %150 = arith.addf %149, %148 : vector<1x128xf32>
    %151 = arith.divf %149, %150 : vector<1x128xf32>
    %152 = math.tanh %146 : vector<1x128xf32>
    %153 = vector.extract_strided_slice %151 {offsets = [0, 0], sizes = [1, 32], strides = [1, 1]} : vector<1x128xf32> to vector<1x32xf32>
    %154 = vector.extract_strided_slice %151 {offsets = [0, 32], sizes = [1, 32], strides = [1, 1]} : vector<1x128xf32> to vector<1x32xf32>
    %155 = vector.extract_strided_slice %152 {offsets = [0, 64], sizes = [1, 32], strides = [1, 1]} : vector<1x128xf32> to vector<1x32xf32>
    %156 = vector.extract_strided_slice %151 {offsets = [0, 96], sizes = [1, 32], strides = [1, 1]} : vector<1x128xf32> to vector<1x32xf32>
    %157 = arith.mulf %154, %121 : vector<1x32xf32>
    %158 = arith.mulf %153, %155 : vector<1x32xf32>
    %159 = arith.addf %157, %158 : vector<1x32xf32>
    %160 = math.tanh %159 : vector<1x32xf32>
    %161 = arith.mulf %156, %160 : vector<1x32xf32>
    %c4 = arith.constant 4 : index
    %c0_34 = arith.constant 0 : index
    %162 = vector.load %arg1[%c4, %c0_34] : memref<8x128xf32, #tpu.memory_space<vmem>>, vector<1x128xf32>
    %163 = arith.truncf %142 : vector<1x32xf32> to vector<1x32xbf16>
    %cst_35 = arith.constant dense<0.000000e+00> : vector<1x128xf32>
    %164 = tpu.matmul %163, %3, %cst_35 {dimension_numbers = #tpu.dot_dimension_numbers<[1], [0], [0], [1], [0, 0, 1, 1], [], []>} : vector<1x32xbf16>, vector<32x128xbf16>, vector<1x128xf32> -> vector<1x128xf32>
    %165 = arith.addf %162, %164 : vector<1x128xf32>
    %166 = arith.negf %165 : vector<1x128xf32>
    %167 = math.exp %166 : vector<1x128xf32>
    %cst_36 = arith.constant 1.000000e+00 : f32
    %168 = vector.broadcast %cst_36 : f32 to vector<1x128xf32>
    %169 = arith.addf %168, %167 : vector<1x128xf32>
    %170 = arith.divf %168, %169 : vector<1x128xf32>
    %171 = math.tanh %165 : vector<1x128xf32>
    %172 = vector.extract_strided_slice %170 {offsets = [0, 0], sizes = [1, 32], strides = [1, 1]} : vector<1x128xf32> to vector<1x32xf32>
    %173 = vector.extract_strided_slice %170 {offsets = [0, 32], sizes = [1, 32], strides = [1, 1]} : vector<1x128xf32> to vector<1x32xf32>
    %174 = vector.extract_strided_slice %171 {offsets = [0, 64], sizes = [1, 32], strides = [1, 1]} : vector<1x128xf32> to vector<1x32xf32>
    %175 = vector.extract_strided_slice %170 {offsets = [0, 96], sizes = [1, 32], strides = [1, 1]} : vector<1x128xf32> to vector<1x32xf32>
    %176 = arith.mulf %173, %140 : vector<1x32xf32>
    %177 = arith.mulf %172, %174 : vector<1x32xf32>
    %178 = arith.addf %176, %177 : vector<1x32xf32>
    %179 = math.tanh %178 : vector<1x32xf32>
    %180 = arith.mulf %175, %179 : vector<1x32xf32>
    %181 = tpu.concatenate %180, %161 in 1 : vector<1x32xf32>, vector<1x32xf32> -> vector<1x64xf32>
    %182 = arith.truncf %181 : vector<1x64xf32> to vector<1x64xbf16>
    %cst_37 = arith.constant dense<0.000000e+00> : vector<1x128xf32>
    %183 = tpu.matmul %182, %4, %cst_37 {dimension_numbers = #tpu.dot_dimension_numbers<[1], [0], [0], [1], [0, 0, 1, 1], [], []>} : vector<1x64xbf16>, vector<64x128xbf16>, vector<1x128xf32> -> vector<1x128xf32>
    %184 = arith.addf %183, %5 : vector<1x128xf32>
    %185 = arith.negf %184 : vector<1x128xf32>
    %186 = math.exp %185 : vector<1x128xf32>
    %cst_38 = arith.constant 1.000000e+00 : f32
    %187 = vector.broadcast %cst_38 : f32 to vector<1x128xf32>
    %188 = arith.addf %187, %186 : vector<1x128xf32>
    %189 = arith.divf %187, %188 : vector<1x128xf32>
    %190 = math.tanh %184 : vector<1x128xf32>
    %191 = vector.extract_strided_slice %189 {offsets = [0, 0], sizes = [1, 32], strides = [1, 1]} : vector<1x128xf32> to vector<1x32xf32>
    %192 = vector.extract_strided_slice %189 {offsets = [0, 32], sizes = [1, 32], strides = [1, 1]} : vector<1x128xf32> to vector<1x32xf32>
    %193 = vector.extract_strided_slice %190 {offsets = [0, 64], sizes = [1, 32], strides = [1, 1]} : vector<1x128xf32> to vector<1x32xf32>
    %194 = vector.extract_strided_slice %189 {offsets = [0, 96], sizes = [1, 32], strides = [1, 1]} : vector<1x128xf32> to vector<1x32xf32>
    %195 = arith.mulf %192, %159 : vector<1x32xf32>
    %196 = arith.mulf %191, %193 : vector<1x32xf32>
    %197 = arith.addf %195, %196 : vector<1x32xf32>
    %198 = math.tanh %197 : vector<1x32xf32>
    %199 = arith.mulf %194, %198 : vector<1x32xf32>
    %c5 = arith.constant 5 : index
    %c0_39 = arith.constant 0 : index
    %200 = vector.load %arg1[%c5, %c0_39] : memref<8x128xf32, #tpu.memory_space<vmem>>, vector<1x128xf32>
    %201 = arith.truncf %180 : vector<1x32xf32> to vector<1x32xbf16>
    %cst_40 = arith.constant dense<0.000000e+00> : vector<1x128xf32>
    %202 = tpu.matmul %201, %3, %cst_40 {dimension_numbers = #tpu.dot_dimension_numbers<[1], [0], [0], [1], [0, 0, 1, 1], [], []>} : vector<1x32xbf16>, vector<32x128xbf16>, vector<1x128xf32> -> vector<1x128xf32>
    %203 = arith.addf %200, %202 : vector<1x128xf32>
    %204 = arith.negf %203 : vector<1x128xf32>
    %205 = math.exp %204 : vector<1x128xf32>
    %cst_41 = arith.constant 1.000000e+00 : f32
    %206 = vector.broadcast %cst_41 : f32 to vector<1x128xf32>
    %207 = arith.addf %206, %205 : vector<1x128xf32>
    %208 = arith.divf %206, %207 : vector<1x128xf32>
    %209 = math.tanh %203 : vector<1x128xf32>
    %210 = vector.extract_strided_slice %208 {offsets = [0, 0], sizes = [1, 32], strides = [1, 1]} : vector<1x128xf32> to vector<1x32xf32>
    %211 = vector.extract_strided_slice %208 {offsets = [0, 32], sizes = [1, 32], strides = [1, 1]} : vector<1x128xf32> to vector<1x32xf32>
    %212 = vector.extract_strided_slice %209 {offsets = [0, 64], sizes = [1, 32], strides = [1, 1]} : vector<1x128xf32> to vector<1x32xf32>
    %213 = vector.extract_strided_slice %208 {offsets = [0, 96], sizes = [1, 32], strides = [1, 1]} : vector<1x128xf32> to vector<1x32xf32>
    %214 = arith.mulf %211, %178 : vector<1x32xf32>
    %215 = arith.mulf %210, %212 : vector<1x32xf32>
    %216 = arith.addf %214, %215 : vector<1x32xf32>
    %217 = math.tanh %216 : vector<1x32xf32>
    %218 = arith.mulf %213, %217 : vector<1x32xf32>
    %219 = tpu.concatenate %218, %199 in 1 : vector<1x32xf32>, vector<1x32xf32> -> vector<1x64xf32>
    %220 = arith.truncf %219 : vector<1x64xf32> to vector<1x64xbf16>
    %cst_42 = arith.constant dense<0.000000e+00> : vector<1x128xf32>
    %221 = tpu.matmul %220, %4, %cst_42 {dimension_numbers = #tpu.dot_dimension_numbers<[1], [0], [0], [1], [0, 0, 1, 1], [], []>} : vector<1x64xbf16>, vector<64x128xbf16>, vector<1x128xf32> -> vector<1x128xf32>
    %222 = arith.addf %221, %5 : vector<1x128xf32>
    %223 = arith.negf %222 : vector<1x128xf32>
    %224 = math.exp %223 : vector<1x128xf32>
    %cst_43 = arith.constant 1.000000e+00 : f32
    %225 = vector.broadcast %cst_43 : f32 to vector<1x128xf32>
    %226 = arith.addf %225, %224 : vector<1x128xf32>
    %227 = arith.divf %225, %226 : vector<1x128xf32>
    %228 = math.tanh %222 : vector<1x128xf32>
    %229 = vector.extract_strided_slice %227 {offsets = [0, 0], sizes = [1, 32], strides = [1, 1]} : vector<1x128xf32> to vector<1x32xf32>
    %230 = vector.extract_strided_slice %227 {offsets = [0, 32], sizes = [1, 32], strides = [1, 1]} : vector<1x128xf32> to vector<1x32xf32>
    %231 = vector.extract_strided_slice %228 {offsets = [0, 64], sizes = [1, 32], strides = [1, 1]} : vector<1x128xf32> to vector<1x32xf32>
    %232 = vector.extract_strided_slice %227 {offsets = [0, 96], sizes = [1, 32], strides = [1, 1]} : vector<1x128xf32> to vector<1x32xf32>
    %233 = arith.mulf %230, %197 : vector<1x32xf32>
    %234 = arith.mulf %229, %231 : vector<1x32xf32>
    %235 = arith.addf %233, %234 : vector<1x32xf32>
    %236 = math.tanh %235 : vector<1x32xf32>
    %237 = arith.mulf %232, %236 : vector<1x32xf32>
    %c6 = arith.constant 6 : index
    %c0_44 = arith.constant 0 : index
    %238 = vector.load %arg1[%c6, %c0_44] : memref<8x128xf32, #tpu.memory_space<vmem>>, vector<1x128xf32>
    %239 = arith.truncf %218 : vector<1x32xf32> to vector<1x32xbf16>
    %cst_45 = arith.constant dense<0.000000e+00> : vector<1x128xf32>
    %240 = tpu.matmul %239, %3, %cst_45 {dimension_numbers = #tpu.dot_dimension_numbers<[1], [0], [0], [1], [0, 0, 1, 1], [], []>} : vector<1x32xbf16>, vector<32x128xbf16>, vector<1x128xf32> -> vector<1x128xf32>
    %241 = arith.addf %238, %240 : vector<1x128xf32>
    %242 = arith.negf %241 : vector<1x128xf32>
    %243 = math.exp %242 : vector<1x128xf32>
    %cst_46 = arith.constant 1.000000e+00 : f32
    %244 = vector.broadcast %cst_46 : f32 to vector<1x128xf32>
    %245 = arith.addf %244, %243 : vector<1x128xf32>
    %246 = arith.divf %244, %245 : vector<1x128xf32>
    %247 = math.tanh %241 : vector<1x128xf32>
    %248 = vector.extract_strided_slice %246 {offsets = [0, 0], sizes = [1, 32], strides = [1, 1]} : vector<1x128xf32> to vector<1x32xf32>
    %249 = vector.extract_strided_slice %246 {offsets = [0, 32], sizes = [1, 32], strides = [1, 1]} : vector<1x128xf32> to vector<1x32xf32>
    %250 = vector.extract_strided_slice %247 {offsets = [0, 64], sizes = [1, 32], strides = [1, 1]} : vector<1x128xf32> to vector<1x32xf32>
    %251 = vector.extract_strided_slice %246 {offsets = [0, 96], sizes = [1, 32], strides = [1, 1]} : vector<1x128xf32> to vector<1x32xf32>
    %252 = arith.mulf %249, %216 : vector<1x32xf32>
    %253 = arith.mulf %248, %250 : vector<1x32xf32>
    %254 = arith.addf %252, %253 : vector<1x32xf32>
    %255 = math.tanh %254 : vector<1x32xf32>
    %256 = arith.mulf %251, %255 : vector<1x32xf32>
    %257 = tpu.concatenate %256, %237 in 1 : vector<1x32xf32>, vector<1x32xf32> -> vector<1x64xf32>
    %258 = arith.truncf %257 : vector<1x64xf32> to vector<1x64xbf16>
    %cst_47 = arith.constant dense<0.000000e+00> : vector<1x128xf32>
    %259 = tpu.matmul %258, %4, %cst_47 {dimension_numbers = #tpu.dot_dimension_numbers<[1], [0], [0], [1], [0, 0, 1, 1], [], []>} : vector<1x64xbf16>, vector<64x128xbf16>, vector<1x128xf32> -> vector<1x128xf32>
    %260 = arith.addf %259, %5 : vector<1x128xf32>
    %261 = arith.negf %260 : vector<1x128xf32>
    %262 = math.exp %261 : vector<1x128xf32>
    %cst_48 = arith.constant 1.000000e+00 : f32
    %263 = vector.broadcast %cst_48 : f32 to vector<1x128xf32>
    %264 = arith.addf %263, %262 : vector<1x128xf32>
    %265 = arith.divf %263, %264 : vector<1x128xf32>
    %266 = math.tanh %260 : vector<1x128xf32>
    %267 = vector.extract_strided_slice %265 {offsets = [0, 0], sizes = [1, 32], strides = [1, 1]} : vector<1x128xf32> to vector<1x32xf32>
    %268 = vector.extract_strided_slice %265 {offsets = [0, 32], sizes = [1, 32], strides = [1, 1]} : vector<1x128xf32> to vector<1x32xf32>
    %269 = vector.extract_strided_slice %266 {offsets = [0, 64], sizes = [1, 32], strides = [1, 1]} : vector<1x128xf32> to vector<1x32xf32>
    %270 = vector.extract_strided_slice %265 {offsets = [0, 96], sizes = [1, 32], strides = [1, 1]} : vector<1x128xf32> to vector<1x32xf32>
    %271 = arith.mulf %268, %235 : vector<1x32xf32>
    %272 = arith.mulf %267, %269 : vector<1x32xf32>
    %273 = arith.addf %271, %272 : vector<1x32xf32>
    %274 = math.tanh %273 : vector<1x32xf32>
    %275 = arith.mulf %270, %274 : vector<1x32xf32>
    %c7 = arith.constant 7 : index
    %c0_49 = arith.constant 0 : index
    %276 = vector.load %arg1[%c7, %c0_49] : memref<8x128xf32, #tpu.memory_space<vmem>>, vector<1x128xf32>
    %277 = arith.truncf %256 : vector<1x32xf32> to vector<1x32xbf16>
    %cst_50 = arith.constant dense<0.000000e+00> : vector<1x128xf32>
    %278 = tpu.matmul %277, %3, %cst_50 {dimension_numbers = #tpu.dot_dimension_numbers<[1], [0], [0], [1], [0, 0, 1, 1], [], []>} : vector<1x32xbf16>, vector<32x128xbf16>, vector<1x128xf32> -> vector<1x128xf32>
    %279 = arith.addf %276, %278 : vector<1x128xf32>
    %280 = arith.negf %279 : vector<1x128xf32>
    %281 = math.exp %280 : vector<1x128xf32>
    %cst_51 = arith.constant 1.000000e+00 : f32
    %282 = vector.broadcast %cst_51 : f32 to vector<1x128xf32>
    %283 = arith.addf %282, %281 : vector<1x128xf32>
    %284 = arith.divf %282, %283 : vector<1x128xf32>
    %285 = math.tanh %279 : vector<1x128xf32>
    %286 = vector.extract_strided_slice %284 {offsets = [0, 0], sizes = [1, 32], strides = [1, 1]} : vector<1x128xf32> to vector<1x32xf32>
    %287 = vector.extract_strided_slice %284 {offsets = [0, 32], sizes = [1, 32], strides = [1, 1]} : vector<1x128xf32> to vector<1x32xf32>
    %288 = vector.extract_strided_slice %285 {offsets = [0, 64], sizes = [1, 32], strides = [1, 1]} : vector<1x128xf32> to vector<1x32xf32>
    %289 = vector.extract_strided_slice %284 {offsets = [0, 96], sizes = [1, 32], strides = [1, 1]} : vector<1x128xf32> to vector<1x32xf32>
    %290 = arith.mulf %287, %254 : vector<1x32xf32>
    %291 = arith.mulf %286, %288 : vector<1x32xf32>
    %292 = arith.addf %290, %291 : vector<1x32xf32>
    %293 = math.tanh %292 : vector<1x32xf32>
    %294 = arith.mulf %289, %293 : vector<1x32xf32>
    %295 = tpu.concatenate %294, %275 in 1 : vector<1x32xf32>, vector<1x32xf32> -> vector<1x64xf32>
    %296 = arith.truncf %295 : vector<1x64xf32> to vector<1x64xbf16>
    %cst_52 = arith.constant dense<0.000000e+00> : vector<1x128xf32>
    %297 = tpu.matmul %296, %4, %cst_52 {dimension_numbers = #tpu.dot_dimension_numbers<[1], [0], [0], [1], [0, 0, 1, 1], [], []>} : vector<1x64xbf16>, vector<64x128xbf16>, vector<1x128xf32> -> vector<1x128xf32>
    %298 = arith.addf %297, %5 : vector<1x128xf32>
    %299 = arith.negf %298 : vector<1x128xf32>
    %300 = math.exp %299 : vector<1x128xf32>
    %cst_53 = arith.constant 1.000000e+00 : f32
    %301 = vector.broadcast %cst_53 : f32 to vector<1x128xf32>
    %302 = arith.addf %301, %300 : vector<1x128xf32>
    %303 = arith.divf %301, %302 : vector<1x128xf32>
    %304 = math.tanh %298 : vector<1x128xf32>
    %305 = vector.extract_strided_slice %303 {offsets = [0, 0], sizes = [1, 32], strides = [1, 1]} : vector<1x128xf32> to vector<1x32xf32>
    %306 = vector.extract_strided_slice %303 {offsets = [0, 32], sizes = [1, 32], strides = [1, 1]} : vector<1x128xf32> to vector<1x32xf32>
    %307 = vector.extract_strided_slice %304 {offsets = [0, 64], sizes = [1, 32], strides = [1, 1]} : vector<1x128xf32> to vector<1x32xf32>
    %308 = vector.extract_strided_slice %303 {offsets = [0, 96], sizes = [1, 32], strides = [1, 1]} : vector<1x128xf32> to vector<1x32xf32>
    %309 = arith.mulf %306, %273 : vector<1x32xf32>
    %310 = arith.mulf %305, %307 : vector<1x32xf32>
    %311 = arith.addf %309, %310 : vector<1x32xf32>
    %312 = math.tanh %311 : vector<1x32xf32>
    %313 = arith.mulf %308, %312 : vector<1x32xf32>
    %c0_54 = arith.constant 0 : index
    %c0_55 = arith.constant 0 : index
    %314 = vector.load %arg8[%c0_54, %c0_55] : memref<1x32xf32, #tpu.memory_space<vmem>>, vector<1x32xf32>
    tpu.vector_store %arg8[%c0_54, %c0_55], %294 {strides = array<i32>} : memref<1x32xf32, #tpu.memory_space<vmem>>, vector<1x32xf32>,
    %c0_56 = arith.constant 0 : index
    %c0_57 = arith.constant 0 : index
    %315 = vector.load %arg9[%c0_56, %c0_57] : memref<1x32xf32, #tpu.memory_space<vmem>>, vector<1x32xf32>
    tpu.vector_store %arg9[%c0_56, %c0_57], %292 {strides = array<i32>} : memref<1x32xf32, #tpu.memory_space<vmem>>, vector<1x32xf32>,
    %c0_58 = arith.constant 0 : index
    %c0_59 = arith.constant 0 : index
    %316 = vector.load %arg10[%c0_58, %c0_59] : memref<1x32xf32, #tpu.memory_space<vmem>>, vector<1x32xf32>
    tpu.vector_store %arg10[%c0_58, %c0_59], %313 {strides = array<i32>} : memref<1x32xf32, #tpu.memory_space<vmem>>, vector<1x32xf32>,
    %c0_60 = arith.constant 0 : index
    %c0_61 = arith.constant 0 : index
    %317 = vector.load %arg11[%c0_60, %c0_61] : memref<1x32xf32, #tpu.memory_space<vmem>>, vector<1x32xf32>
    tpu.vector_store %arg11[%c0_60, %c0_61], %311 {strides = array<i32>} : memref<1x32xf32, #tpu.memory_space<vmem>>, vector<1x32xf32>,
    %318 = tpu.concatenate %47, %85, %123, %161, %199, %237, %275, %313 in 0 : vector<1x32xf32>, vector<1x32xf32>, vector<1x32xf32>, vector<1x32xf32>, vector<1x32xf32>, vector<1x32xf32>, vector<1x32xf32>, vector<1x32xf32> -> vector<8x32xf32>
    %319 = arith.truncf %318 : vector<8x32xf32> to vector<8x32xbf16>
    %c0_62 = arith.constant 0 : index
    %c0_63 = arith.constant 0 : index
    %320 = vector.load %arg5[%c0_62, %c0_63] : memref<32x128xbf16, #tpu.memory_space<vmem>>, vector<32x128xbf16>
    %cst_64 = arith.constant dense<0.000000e+00> : vector<8x128xf32>
    %321 = tpu.matmul %319, %320, %cst_64 {dimension_numbers = #tpu.dot_dimension_numbers<[1], [0], [0], [1], [0, 0, 1, 1], [], []>} : vector<8x32xbf16>, vector<32x128xbf16>, vector<8x128xf32> -> vector<8x128xf32>
    %c0_65 = arith.constant 0 : index
    %c0_66 = arith.constant 0 : index
    %322 = vector.load %arg6[%c0_65, %c0_66] : memref<1x128xf32, #tpu.memory_space<vmem>>, vector<1x128xf32>
    %323 = vector.broadcast %322 : vector<1x128xf32> to vector<8x128xf32>
    %324 = arith.addf %321, %323 : vector<8x128xf32>
    %cst_67 = arith.constant 0.000000e+00 : f32
    %325 = vector.broadcast %cst_67 : f32 to vector<8x128xf32>
    %326 = arith.maximumf %324, %325 : vector<8x128xf32>
    %327 = tpu.iota {dimensions = array<i32: 1>} : vector<8x128xi32>
    %c64_i32 = arith.constant 64 : i32
    %328 = vector.broadcast %c64_i32 : i32 to vector<8x128xi32>
    %329 = arith.cmpi slt, %327, %328 : vector<8x128xi32>
    %cst_68 = arith.constant -1.000000e+30 : f32
    %330 = vector.broadcast %cst_68 : f32 to vector<8x128xf32>
    %331 = arith.select %329, %326, %330 : vector<8x128xi1>, vector<8x128xf32>
    %cst_69 = arith.constant dense<0xFF800000> : vector<8xf32>
    %332 = vector.multi_reduction <maximumf>, %331, %cst_69 [1] : vector<8x128xf32> to vector<8xf32>
    %333 = vector.shape_cast %332 : vector<8xf32> to vector<8x1xf32>
    %334 = vector.broadcast %333 : vector<8x1xf32> to vector<8x128xf32>
    %335 = arith.subf %331, %334 : vector<8x128xf32>
    %336 = math.exp %335 : vector<8x128xf32>
    %cst_70 = arith.constant dense<0.000000e+00> : vector<8xf32>
    %337 = vector.multi_reduction <add>, %336, %cst_70 [1] : vector<8x128xf32> to vector<8xf32>
    %338 = vector.shape_cast %337 : vector<8xf32> to vector<8x1xf32>
    %339 = math.log %338 : vector<8x1xf32>
    %340 = arith.addf %339, %333 : vector<8x1xf32>
    %341 = vector.broadcast %340 : vector<8x1xf32> to vector<8x128xf32>
    %342 = arith.subf %331, %341 : vector<8x128xf32>
    %c0_71 = arith.constant 0 : index
    %c0_72 = arith.constant 0 : index
    %343 = vector.load %arg7[%c0_71, %c0_72] : memref<8x128xf32, #tpu.memory_space<vmem>>, vector<8x128xf32>
    tpu.vector_store %arg7[%c0_71, %c0_72], %342 {strides = array<i32>} : memref<8x128xf32, #tpu.memory_space<vmem>>, vector<8x128xf32>,
    return
  }
  func.func @transform_0(%arg0: i32) -> (i32, i32) {
    %c0_i32 = arith.constant 0 : i32
    %c0_i32_0 = arith.constant 0 : i32
    return %arg0, %c0_i32 : i32, i32
  }
  func.func @transform_1(%arg0: i32) -> (i32, i32) {
    %c0_i32 = arith.constant 0 : i32
    %c0_i32_0 = arith.constant 0 : i32
    %c0_i32_1 = arith.constant 0 : i32
    return %c0_i32, %c0_i32_0 : i32, i32
  }
  func.func @transform_2(%arg0: i32) -> (i32, i32) {
    %c0_i32 = arith.constant 0 : i32
    %c0_i32_0 = arith.constant 0 : i32
    %c0_i32_1 = arith.constant 0 : i32
    return %c0_i32, %c0_i32_0 : i32, i32
  }
  func.func @transform_3(%arg0: i32) -> (i32, i32) {
    %c0_i32 = arith.constant 0 : i32
    %c0_i32_0 = arith.constant 0 : i32
    %c0_i32_1 = arith.constant 0 : i32
    return %c0_i32, %c0_i32_0 : i32, i32
  }
  func.func @transform_4(%arg0: i32) -> (i32, i32) {
    %c0_i32 = arith.constant 0 : i32
    %c0_i32_0 = arith.constant 0 : i32
    %c0_i32_1 = arith.constant 0 : i32
    return %c0_i32, %c0_i32_0 : i32, i32
  }
  func.func @transform_5(%arg0: i32) -> (i32, i32) {
    %c0_i32 = arith.constant 0 : i32
    %c0_i32_0 = arith.constant 0 : i32
    %c0_i32_1 = arith.constant 0 : i32
    return %c0_i32, %c0_i32_0 : i32, i32
  }
  func.func @transform_6(%arg0: i32) -> (i32, i32) {
    %c0_i32 = arith.constant 0 : i32
    %c0_i32_0 = arith.constant 0 : i32
    return %arg0, %c0_i32 : i32, i32
  }
}

</mosaic_0001>

<bundles_post_ra>
// kernel: poetry_forward.1
= control target key start
LH: loop header
LB: loop body
LE: loop exit
PB: predicated region body
PF: predicated region fallthrough
CT: control target
= control target key end

     0   :  { %v1908_v1 = vmov 0.0   ;;  %vm1909_vm0 = vmmov 0   ;;  %vm29_vm1 = vcmask 253952   ;;  %s2358_s0 = inlined_call_operand.vmem [shape: f32[8,128], index: 0, kind: input, shape index: {}]   ;;  %s2359_s1 = inlined_call_operand.vmem [shape: bf16[32,128], index: 1, kind: input, shape index: {}]   ;;  %s2360_s2 = inlined_call_operand.vmem [shape: bf16[64,128], index: 2, kind: input, shape index: {}]   ;;  %s2361_s3 = inlined_call_operand.vmem [shape: f32[1,128], index: 3, kind: input, shape index: {}]   ;;  %s2362_s4 = inlined_call_operand.vmem [shape: bf16[32,128], index: 4, kind: input, shape index: {}]   ;;  %s2363_s5 = inlined_call_operand.vmem [shape: f32[1,128], index: 5, kind: input, shape index: {}]   ;;  %s2364_s6 = inlined_call_operand.hbm [shape: f32[8,128], index: 6, kind: output, shape index: {}]  }
   0x1   :  { %v1952_v0 = vld [vmem:[%s2359_s1] sm:$0xff]   ;;  %1564 = vmatprep.subr.bf16.mxu0 %v1908_v1  ;;  %1572 = vmatprep.subr.bf16.mxu1 %v1908_v1  ;;  %v1960_v2 = vld [vmem:[%s2359_s1 + $0x8] sm:$0xff]   ;;  %30 = vst.msk [vmem:[#allocation2] sm:$0x1] %vm29_vm1, %v1908_v1  ;;  %31 = vst.msk [vmem:[#allocation3] sm:$0x1] %vm29_vm1, %v1908_v1 }
   0x2   :  { %1565 = vmatpush3.bf16.msra.mxu0 %v1952_v0  ;;  %1568 = vmatprep.mubr.msk.bf16.mxu0 %vm1909_vm0, %v1908_v1  ;;  %32 = vst.msk [vmem:[#allocation4] sm:$0x1] %vm29_vm1, %v1908_v1  ;;  %33 = vst.msk [vmem:[#allocation5] sm:$0x1] %vm29_vm1, %v1908_v1 }
   0x3   :  { %1566 = vmatprep.subr.bf16.mxu0 %v1908_v1  ;;  %1580 = vmatprep.mubr.msk.bf16.mxu1 %vm1909_vm0, %v1908_v1 }
   0x6   :  { %1567 = vmatpush3.bf16.msra.mxu0 %v1960_v2 }
   0x7   :  { %11 = vsyncpa [#allocation7], 0  ;;  %1584 = vmatprep.subr.bf16.mxu0 %v1908_v1  ;;  %vm65_vm2 = vcmask 261120   ;;  %v51_v5 = vld [vmem:[%s2358_s0] sm:$0x1]  ;;  %s1910_s26 = smov 64  }
   0x8   :  { %v47_v3 = vld [vmem:[#allocation2] sm:$0x1]  ;;  %v1456_v12 = vld [vmem:[#allocation3] ss:$0 sm:$0xff]  ;;  %s1911_s27 = smov 32   ;;  %v2002_v24 = vld [vmem:[%s2360_s2 + $0x8] sm:$0xff]  }
   0x9   :  { %v52_v4 = vpack.c.bf16 %v47_v3, %v47_v3  ;;  %v1996_v23 = vld [vmem:[%s2360_s2] sm:$0xff]   ;;  %v2009_v25 = vld [vmem:[%s2360_s2 + $0x10] sm:$0xff]   ;;  %v2018_v27 = vld [vmem:[%s2360_s2 + $0x18] sm:$0xff]   ;;  %vm180_vm3 = vcmask 523264   ;;  %vm1337_vm4 = vcmask 1040384   ;;  %vm1339_vm5 = vcmask 1041408  }
   0xa   :  { %1573 = vmatpush3.bf16.msra.mxu1 %v1996_v23  ;;  %v1457_v28 = vld [vmem:[#allocation4] ss:$0 sm:$0xff]  ;;  %v256_v39 = vld [vmem:[%s2358_s0 + $0x1] sm:$0x1]  ;;  %v2049_v45 = vld [vmem:[%s2361_s3] sm:$0x1] }
   0xb   :  { %1569 = vmatmul.mubr.msk.bf16.vlgmr.msra.gmra.mrb[0].mxu0 %vm65_vm2, %v52_v4  ;;  %1574 = vmatprep.subr.bf16.mxu1 %v1908_v1  ;;  %v1464_v53 = vld [vmem:[#allocation5] ss:$0 sm:$0xff]  ;;  %vm1341_vm6 = vcmask 1042432   ;;  %vm1343_vm7 = vcmask 1043456   ;;  %vm1345_vm8 = vcmask 1044480   ;;  %vm1347_vm9 = vcmask 1045504  }
   0xc   :  { %1585 = vmatpush3.bf16.msra.mxu0 %v1952_v0  ;;  %1588 = vmatprep.mubr.msk.bf16.mxu0 %vm1909_vm0, %v1908_v1  ;;  %vm1349_vm10 = vcmask 1046528  }
   0xd   :  { %1586 = vmatprep.subr.bf16.mxu0 %v1908_v1 }
   0xe   :  { %1575 = vmatpush3.bf16.msra.mxu1 %v2002_v24 }
   0xf   :  { %1576 = vmatprep.subr.bf16.mxu1 %v1908_v1 }
  0x10   :  { %1587 = vmatpush3.bf16.msra.mxu0 %v1960_v2 }
  0x11   :  { %1592 = vmatprep.subr.bf16.mxu0 %v1908_v1 }
  0x12   :  { %1577 = vmatpush3.bf16.msra.mxu1 %v2009_v25 }
  0x13   :  { %1578 = vmatprep.subr.bf16.mxu1 %v1908_v1 }
  0x16   :  { %1579 = vmatpush3.bf16.msra.mxu1 %v2018_v27 }
  0x17   :  { %1604 = vmatprep.subr.bf16.mxu1 %v1908_v1 }
  0xde   :  { %v103_v6 = vpop.f32.mrb[0].mxu0 }
  0xdf   :  { %v109_v7 = vadd.f32 %v103_v6, %v51_v5  ;;  %v1570_v8 = vpop.f32.mrb[1].mxu0 }
  0xe0   :  { %v106_v9 = vpop.f32.mrb[2].mxu0 }
  0xe1   :  { %1751 = vtanh.f32 %v109_v7  ;;  %v1571_v10 = vpop.f32.mrb[3].mxu0  ;;  %v1455_v13 = vmul.f32 -1.442695, %v109_v7 }
  0xe3   :  { %1753 = vpow2.f32 %v1455_v13 }
  0xeb   :  { %v1752_v11 = vpop.eup %1751 }
  0xec   :  { %127 = vrot.lane.b32.xlu0 %v1752_v11, %s1910_s26 }
  0xed   :  { %v1754_v14 = vpop.eup %1753 }
  0xee   :  { %v113_v15 = vadd.f32 1.0, %v1754_v14 }
  0xf0   :  { %122 = vrot.lane.b32.xlu0 %v1456_v12, %s1911_s27  ;;  %1755 = vrcp.f32 %v113_v15 }
  0xfa   :  { %v1756_v16 = vpop.eup %1755 }
 0x15e   :  { %v128_v17 = vpop.permute.xlu0 %127 }
 0x15f   :  { %v130_v18 = vmul.f32 %v1756_v16, %v128_v17 }
 0x161   :  { %132 = vrot.lane.b32.xlu1 %v130_v18, %s1911_s27 }
 0x162   :  { %v123_v19 = vpop.permute.xlu0 %122 }
 0x163   :  { %v125_v20 = vmul.f32 %v1756_v16, %v123_v19 }
 0x1d3   :  { %v133_v21 = vpop.permute.xlu1 %132 }
 0x1d4   :  { %v1990_v22 = vadd.f32 %v133_v21, %v125_v20 }
 0x1d6   :  { %1757 = vtanh.f32 %v1990_v22 }
 0x1e0   :  { %v1758_v26 = vpop.eup %1757 }
 0x1e1   :  { %138 = vrot.lane.b32.xlu1 %v1758_v26, %s1910_s26 }
 0x253   :  { %v139_v29 = vpop.permute.xlu1 %138 }
 0x254   :  { %v141_v30 = vmul.f32 %v1756_v16, %v139_v29 }
 0x256   :  { %v1738_v31 = vpack.i.bf16 %v1457_v28, %v141_v30  ;;  %v257_v32 = vpack.c.bf16 %v141_v30, %v141_v30  ;;  %v406_v28 = vld [vmem:[%s2358_s0 + $0x2] sm:$0x1] }
 0x258   :  { %1739 = vrot.lane.b32.xlu0 %v1738_v31, %s1911_s27  ;;  %259 = vrot.lane.b32.xlu1 %v257_v32, %s1911_s27 }
 0x2ca   :  { %v1740_v33 = vpop.permute.xlu0 %1739  ;;  %v260_v34 = vpop.permute.xlu1 %259 }
 0x2cb   :  { %v1742_v35 = vunpack.i.h.bf16 %v1740_v33  ;;  %v1741_v36 = vunpack.i.l.bf16 %v1740_v33  ;;  %1589 = vmatmul.mubr.msk.bf16.vlgmr.msra.gmra.mrb[4].mxu0 %vm65_vm2, %v260_v34 }
 0x2cc   :  { %1593 = vmatpush3.bf16.msra.mxu0 %v1996_v23  ;;  %1600 = vmatprep.mubr.msk.bf16.mxu0 %vm1909_vm0, %v1908_v1 }
 0x2cd   :  { %v154_v37 = vsel %vm65_vm2, %v1741_v36, %v1742_v35  ;;  %1594 = vmatprep.subr.bf16.mxu0 %v1908_v1 }
 0x2ce   :  { %v155_v38 = vpack.c.bf16 %v154_v37, %v154_v37 }
 0x2d0   :  { %1581 = vmatmul.mubr.msk.bf16.vlgmr.msra.gmra.mrb[0].mxu1 %vm180_vm3, %v155_v38  ;;  %1595 = vmatpush3.bf16.msra.mxu0 %v2002_v24 }
 0x2d1   :  { %1605 = vmatpush3.bf16.msra.mxu1 %v1952_v0  ;;  %1596 = vmatprep.subr.bf16.mxu0 %v1908_v1 }
 0x2d2   :  { %1606 = vmatprep.subr.bf16.mxu1 %v1908_v1  ;;  %1608 = vmatprep.mubr.msk.bf16.mxu1 %vm1909_vm0, %v1908_v1 }
 0x2d4   :  { %1597 = vmatpush3.bf16.msra.mxu0 %v2009_v25 }
 0x2d5   :  { %1607 = vmatpush3.bf16.msra.mxu1 %v1960_v2  ;;  %1598 = vmatprep.subr.bf16.mxu0 %v1908_v1 }
 0x2d6   :  { %1612 = vmatprep.subr.bf16.mxu1 %v1908_v1 }
 0x2d8   :  { %1599 = vmatpush3.bf16.msra.mxu0 %v2018_v27 }
 0x2d9   :  { %1624 = vmatprep.subr.bf16.mxu0 %v1908_v1 }
 0x39e   :  { %v298_v40 = vpop.f32.mrb[4].mxu0 }
 0x39f   :  { %v304_v41 = vadd.f32 %v298_v40, %v256_v39  ;;  %v1590_v42 = vpop.f32.mrb[5].mxu0 }
 0x3a0   :  { %v301_v43 = vpop.f32.mrb[6].mxu0 }
 0x3a1   :  { %1759 = vtanh.f32 %v304_v41  ;;  %v1591_v44 = vpop.f32.mrb[7].mxu0  ;;  %v1466_v54 = vmul.f32 -1.442695, %v304_v41 }
 0x3a3   :  { %v218_v46 = vpop.f32.mrb[0].mxu1 }
 0x3a4   :  { %v219_v47 = vadd.f32 %v218_v46, %v2049_v45  ;;  %v1582_v48 = vpop.f32.mrb[1].mxu1 }
 0x3a5   :  { %v221_v49 = vpop.f32.mrb[2].mxu1 }
 0x3a6   :  { %1761 = vtanh.f32 %v219_v47  ;;  %v1583_v50 = vpop.f32.mrb[3].mxu1  ;;  %v1463_v55 = vmul.f32 -1.442695, %v219_v47 }
 0x3a7   :  { %1763 = vpow2.f32 %v1466_v54 }
 0x3a8   :  { %1765 = vpow2.f32 %v1463_v55 }
 0x3ab   :  { %v1760_v51 = vpop.eup %1759 }
 0x3ac   :  { %314 = vrot.lane.b32.xlu1 %v1760_v51, %s1910_s26 }
 0x3b0   :  { %v1762_v52 = vpop.eup %1761 }
 0x3b1   :  { %241 = vrot.lane.b32.xlu0 %v1762_v52, %s1910_s26  ;;  %v1764_v56 = vpop.eup %1763 }
 0x3b2   :  { %v308_v57 = vadd.f32 1.0, %v1764_v56  ;;  %v1766_v58 = vpop.eup %1765 }
 0x3b3   :  { %v227_v59 = vadd.f32 1.0, %v1766_v58 }
 0x3b4   :  { %1767 = vrcp.f32 %v308_v57 }
 0x3b5   :  { %236 = vrot.lane.b32.xlu0 %v1464_v53, %s1911_s27  ;;  %1769 = vrcp.f32 %v227_v59 }
 0x3be   :  { %v1768_v60 = vpop.eup %1767 }
 0x3bf   :  { %v1770_v63 = vpop.eup %1769  ;;  %v312_v6 = vmul.f32 %v1768_v60, %v1990_v22 }
 0x41e   :  { %v315_v61 = vpop.permute.xlu1 %314 }
 0x41f   :  { %v317_v62 = vmul.f32 %v1768_v60, %v315_v61 }
 0x421   :  { %319 = vrot.lane.b32.xlu0 %v317_v62, %s1911_s27 }
 0x423   :  { %v242_v3 = vpop.permute.xlu0 %241 }
 0x424   :  { %v244_v4 = vmul.f32 %v1770_v63, %v242_v3 }
 0x426   :  { %246 = vrot.lane.b32.xlu1 %v244_v4, %s1911_s27 }
 0x427   :  { %v237_v5 = vpop.permute.xlu0 %236 }
 0x428   :  { %v239_v9 = vmul.f32 %v1770_v63, %v237_v5 }
 0x493   :  { %v320_v7 = vpop.permute.xlu0 %319 }
 0x494   :  { %v2058_v8 = vadd.f32 %v320_v7, %v312_v6 }
 0x496   :  { %1771 = vtanh.f32 %v2058_v8 }
 0x498   :  { %v247_v10 = vpop.permute.xlu1 %246 }
 0x499   :  { %v2061_v11 = vadd.f32 %v247_v10, %v239_v9 }
 0x49b   :  { %1773 = vtanh.f32 %v2061_v11 }
 0x4a0   :  { %v1772_v12 = vpop.eup %1771 }
 0x4a1   :  { %325 = vrot.lane.b32.xlu0 %v1772_v12, %s1910_s26 }
 0x4a5   :  { %v1774_v13 = vpop.eup %1773 }
 0x4a6   :  { %252 = vrot.lane.b32.xlu1 %v1774_v13, %s1910_s26 }
 0x513   :  { %v326_v14 = vpop.permute.xlu0 %325 }
 0x514   :  { %v328_v15 = vmul.f32 %v1768_v60, %v326_v14 }
 0x516   :  { %330 = vrot.lane.b32.xlu1 %v328_v15, %s1911_s27  ;;  %v407_v16 = vpack.c.bf16 %v328_v15, %v328_v15 }
 0x518   :  { %v253_v17 = vpop.permute.xlu1 %252 }
 0x519   :  { %v2067_v18 = vmul.f32 %v1770_v63, %v253_v17 }
 0x51a   :  { %409 = vrot.lane.b32.xlu1 %v407_v16, %s1911_s27 }
 0x51b   :  { %334 = vrot.lane.b32.xlu0 %v2067_v18, %s1910_s26 }
 0x588   :  { %v331_v19 = vpop.permute.xlu1 %330 }
 0x58c   :  { %v410_v20 = vpop.permute.xlu1 %409 }
 0x58d   :  { %1609 = vmatmul.mubr.msk.bf16.vlgmr.msra.gmra.mrb[4].mxu1 %vm65_vm2, %v410_v20  ;;  %v335_v21 = vpop.permute.xlu0 %334 }
 0x58e   :  { %v337_v22 = vsel %vm65_vm2, %v331_v19, %v335_v21  ;;  %1613 = vmatpush3.bf16.msra.mxu1 %v1996_v23  ;;  %1620 = vmatprep.mubr.msk.bf16.mxu1 %vm1909_vm0, %v1908_v1 }
 0x58f   :  { %v338_v26 = vpack.c.bf16 %v337_v22, %v337_v22  ;;  %1614 = vmatprep.subr.bf16.mxu1 %v1908_v1 }
 0x591   :  { %1601 = vmatmul.mubr.msk.bf16.vlgmr.msra.gmra.mrb[8].mxu0 %vm180_vm3, %v338_v26 }
 0x592   :  { %1615 = vmatpush3.bf16.msra.mxu1 %v2002_v24  ;;  %1625 = vmatpush3.bf16.msra.mxu0 %v1952_v0 }
 0x593   :  { %1616 = vmatprep.subr.bf16.mxu1 %v1908_v1  ;;  %1626 = vmatprep.subr.bf16.mxu0 %v1908_v1 }
 0x594   :  { %1628 = vmatprep.mubr.msk.bf16.mxu0 %vm1909_vm0, %v1908_v1 }
 0x596   :  { %1617 = vmatpush3.bf16.msra.mxu1 %v2009_v25  ;;  %1627 = vmatpush3.bf16.msra.mxu0 %v1960_v2 }
 0x597   :  { %1618 = vmatprep.subr.bf16.mxu1 %v1908_v1  ;;  %1632 = vmatprep.subr.bf16.mxu0 %v1908_v1 }
 0x59a   :  { %1619 = vmatpush3.bf16.msra.mxu1 %v2018_v27 }
 0x59b   :  { %1644 = vmatprep.subr.bf16.mxu1 %v1908_v1 }
 0x660   :  { %v448_v29 = vpop.f32.mrb[4].mxu1 }
 0x661   :  { %v454_v30 = vadd.f32 %v448_v29, %v406_v28  ;;  %v1610_v31 = vpop.f32.mrb[5].mxu1 }
 0x662   :  { %v451_v32 = vpop.f32.mrb[6].mxu1 }
 0x663   :  { %1775 = vtanh.f32 %v454_v30  ;;  %v1611_v33 = vpop.f32.mrb[7].mxu1  ;;  %v1470_v41 = vmul.f32 -1.442695, %v454_v30 }
 0x664   :  { %v376_v34 = vpop.f32.mrb[8].mxu0 }
 0x665   :  { %v377_v35 = vadd.f32 %v376_v34, %v2049_v45  ;;  %v1602_v36 = vpop.f32.mrb[9].mxu0 }
 0x666   :  { %v379_v37 = vpop.f32.mrb[10].mxu0 }
 0x667   :  { %1777 = vtanh.f32 %v377_v35  ;;  %v1603_v38 = vpop.f32.mrb[11].mxu0  ;;  %v1468_v42 = vmul.f32 -1.442695, %v377_v35 }
 0x668   :  { %1779 = vpow2.f32 %v1470_v41 }
 0x669   :  { %1781 = vpow2.f32 %v1468_v42 }
 0x66d   :  { %v1776_v39 = vpop.eup %1775 }
 0x66e   :  { %464 = vrot.lane.b32.xlu1 %v1776_v39, %s1910_s26 }
 0x671   :  { %v1778_v40 = vpop.eup %1777 }
 0x672   :  { %391 = vrot.lane.b32.xlu0 %v1778_v40, %s1910_s26  ;;  %v1780_v43 = vpop.eup %1779 }
 0x673   :  { %v458_v44 = vadd.f32 1.0, %v1780_v43  ;;  %v1782_v46 = vpop.eup %1781 }
 0x674   :  { %v385_v47 = vadd.f32 1.0, %v1782_v46 }
 0x675   :  { %1783 = vrcp.f32 %v458_v44 }
 0x676   :  { %1785 = vrcp.f32 %v385_v47 }
 0x67f   :  { %v1784_v48 = vpop.eup %1783 }
 0x680   :  { %v1786_v51 = vpop.eup %1785  ;;  %v462_v54 = vmul.f32 %v1784_v48, %v2058_v8 }
 0x681   :  { %v389_v57 = vmul.f32 %v1786_v51, %v2061_v11  ;;  %v556_v11 = vld [vmem:[%s2358_s0 + $0x3] sm:$0x1] }
 0x6e0   :  { %v465_v49 = vpop.permute.xlu1 %464 }
 0x6e1   :  { %v467_v50 = vmul.f32 %v1784_v48, %v465_v49 }
 0x6e3   :  { %469 = vrot.lane.b32.xlu1 %v467_v50, %s1911_s27 }
 0x6e4   :  { %v392_v52 = vpop.permute.xlu0 %391 }
 0x6e5   :  { %v394_v53 = vmul.f32 %v1786_v51, %v392_v52 }
 0x6e7   :  { %396 = vrot.lane.b32.xlu0 %v394_v53, %s1911_s27 }
 0x755   :  { %v470_v55 = vpop.permute.xlu1 %469 }
 0x756   :  { %v2100_v56 = vadd.f32 %v470_v55, %v462_v54 }
 0x758   :  { %1787 = vtanh.f32 %v2100_v56 }
 0x759   :  { %v397_v58 = vpop.permute.xlu0 %396 }
 0x75a   :  { %v2104_v59 = vadd.f32 %v397_v58, %v389_v57 }
 0x75c   :  { %1789 = vtanh.f32 %v2104_v59 }
 0x762   :  { %v1788_v60 = vpop.eup %1787 }
 0x763   :  { %475 = vrot.lane.b32.xlu1 %v1788_v60, %s1910_s26 }
 0x766   :  { %v1790_v61 = vpop.eup %1789 }
 0x767   :  { %402 = vrot.lane.b32.xlu0 %v1790_v61, %s1910_s26 }
 0x7d5   :  { %v476_v62 = vpop.permute.xlu1 %475 }
 0x7d6   :  { %v478_v63 = vmul.f32 %v1784_v48, %v476_v62 }
 0x7d8   :  { %480 = vrot.lane.b32.xlu0 %v478_v63, %s1911_s27  ;;  %v557_v4 = vpack.c.bf16 %v478_v63, %v478_v63 }
 0x7d9   :  { %v403_v3 = vpop.permute.xlu0 %402 }
 0x7da   :  { %v2110_v5 = vmul.f32 %v1786_v51, %v403_v3 }
 0x7dc   :  { %559 = vrot.lane.b32.xlu0 %v557_v4, %s1911_s27  ;;  %484 = vrot.lane.b32.xlu1 %v2110_v5, %s1910_s26  ;;  %v1323_v52 = vrot.slane %v2110_v5, 7 }
 0x7de   :  { %v1338_v57 = vsel %vm1337_vm4, %v2067_v18, %v1323_v52  ;;  %v706_v18 = vld [vmem:[%s2358_s0 + $0x4] sm:$0x1] }
 0x84a   :  { %v481_v6 = vpop.permute.xlu0 %480 }
 0x84e   :  { %v485_v7 = vpop.permute.xlu1 %484  ;;  %v560_v8 = vpop.permute.xlu0 %559 }
 0x84f   :  { %v487_v9 = vsel %vm65_vm2, %v481_v6, %v485_v7  ;;  %1629 = vmatmul.mubr.msk.bf16.vlgmr.msra.gmra.mrb[12].mxu0 %vm65_vm2, %v560_v8 }
 0x850   :  { %v488_v10 = vpack.c.bf16 %v487_v9, %v487_v9  ;;  %1633 = vmatpush3.bf16.msra.mxu0 %v1996_v23  ;;  %1640 = vmatprep.mubr.msk.bf16.mxu0 %vm1909_vm0, %v1908_v1 }
 0x851   :  { %1634 = vmatprep.subr.bf16.mxu0 %v1908_v1 }
 0x852   :  { %1621 = vmatmul.mubr.msk.bf16.vlgmr.msra.gmra.mrb[8].mxu1 %vm180_vm3, %v488_v10 }
 0x853   :  { %1645 = vmatpush3.bf16.msra.mxu1 %v1952_v0  ;;  %1648 = vmatprep.mubr.msk.bf16.mxu1 %vm1909_vm0, %v1908_v1 }
 0x854   :  { %1635 = vmatpush3.bf16.msra.mxu0 %v2002_v24  ;;  %1646 = vmatprep.subr.bf16.mxu1 %v1908_v1 }
 0x855   :  { %1636 = vmatprep.subr.bf16.mxu0 %v1908_v1 }
 0x857   :  { %1647 = vmatpush3.bf16.msra.mxu1 %v1960_v2 }
 0x858   :  { %1637 = vmatpush3.bf16.msra.mxu0 %v2009_v25  ;;  %1652 = vmatprep.subr.bf16.mxu1 %v1908_v1 }
 0x859   :  { %1638 = vmatprep.subr.bf16.mxu0 %v1908_v1 }
 0x85c   :  { %1639 = vmatpush3.bf16.msra.mxu0 %v2018_v27 }
 0x85d   :  { %1664 = vmatprep.subr.bf16.mxu0 %v1908_v1 }
 0x922   :  { %v598_v12 = vpop.f32.mrb[12].mxu0 }
 0x923   :  { %v604_v13 = vadd.f32 %v598_v12, %v556_v11  ;;  %v1630_v14 = vpop.f32.mrb[13].mxu0 }
 0x924   :  { %v601_v15 = vpop.f32.mrb[14].mxu0 }
 0x925   :  { %1791 = vtanh.f32 %v604_v13  ;;  %v526_v16 = vpop.f32.mrb[8].mxu1  ;;  %v1631_v17 = vpop.f32.mrb[15].mxu0  ;;  %v1474_v29 = vmul.f32 -1.442695, %v604_v13 }
 0x926   :  { %v527_v19 = vadd.f32 %v526_v16, %v2049_v45  ;;  %v1622_v20 = vpop.f32.mrb[9].mxu1 }
 0x927   :  { %v529_v21 = vpop.f32.mrb[10].mxu1 }
 0x928   :  { %1793 = vtanh.f32 %v527_v19  ;;  %v1623_v22 = vpop.f32.mrb[11].mxu1  ;;  %v1472_v30 = vmul.f32 -1.442695, %v527_v19 }
 0x929   :  { %1795 = vpow2.f32 %v1474_v29 }
 0x92a   :  { %1797 = vpow2.f32 %v1472_v30 }
 0x92f   :  { %v1792_v26 = vpop.eup %1791 }
 0x930   :  { %614 = vrot.lane.b32.xlu0 %v1792_v26, %s1910_s26 }
 0x932   :  { %v1794_v28 = vpop.eup %1793 }
 0x933   :  { %541 = vrot.lane.b32.xlu1 %v1794_v28, %s1910_s26  ;;  %v1796_v31 = vpop.eup %1795 }
 0x934   :  { %v1798_v32 = vpop.eup %1797  ;;  %v608_v33 = vadd.f32 1.0, %v1796_v31 }
 0x935   :  { %v535_v34 = vadd.f32 1.0, %v1798_v32 }
 0x936   :  { %1799 = vrcp.f32 %v608_v33 }
 0x937   :  { %1801 = vrcp.f32 %v535_v34 }
 0x940   :  { %v1800_v35 = vpop.eup %1799 }
 0x941   :  { %v1802_v38 = vpop.eup %1801  ;;  %v612_v41 = vmul.f32 %v1800_v35, %v2100_v56 }
 0x942   :  { %v539_v44 = vmul.f32 %v1802_v38, %v2104_v59 }
 0x9a2   :  { %v615_v36 = vpop.permute.xlu0 %614 }
 0x9a3   :  { %v617_v37 = vmul.f32 %v1800_v35, %v615_v36 }
 0x9a5   :  { %v542_v39 = vpop.permute.xlu1 %541  ;;  %619 = vrot.lane.b32.xlu0 %v617_v37, %s1911_s27 }
 0x9a6   :  { %v544_v40 = vmul.f32 %v1802_v38, %v542_v39 }
 0x9a8   :  { %546 = vrot.lane.b32.xlu1 %v544_v40, %s1911_s27 }
 0xa17   :  { %v620_v42 = vpop.permute.xlu0 %619 }
 0xa18   :  { %v2143_v43 = vadd.f32 %v620_v42, %v612_v41 }
 0xa1a   :  { %1803 = vtanh.f32 %v2143_v43  ;;  %v547_v46 = vpop.permute.xlu1 %546 }
 0xa1b   :  { %v2147_v47 = vadd.f32 %v547_v46, %v539_v44 }
 0xa1d   :  { %1805 = vtanh.f32 %v2147_v47 }
 0xa24   :  { %v1804_v48 = vpop.eup %1803 }
 0xa25   :  { %625 = vrot.lane.b32.xlu0 %v1804_v48, %s1910_s26 }
 0xa27   :  { %v1806_v49 = vpop.eup %1805 }
 0xa28   :  { %552 = vrot.lane.b32.xlu1 %v1806_v49, %s1910_s26 }
 0xa97   :  { %v626_v50 = vpop.permute.xlu0 %625 }
 0xa98   :  { %v628_v51 = vmul.f32 %v1800_v35, %v626_v50 }
 0xa9a   :  { %v553_v53 = vpop.permute.xlu1 %552  ;;  %630 = vrot.lane.b32.xlu1 %v628_v51, %s1911_s27  ;;  %v707_v55 = vpack.c.bf16 %v628_v51, %v628_v51 }
 0xa9b   :  { %v555_v54 = vmul.f32 %v1802_v38, %v553_v53  ;;  %v856_v53 = vld [vmem:[%s2358_s0 + $0x5] sm:$0x1] }
 0xa9d   :  { %v1325_v56 = vrot.slane %v555_v54, 6  ;;  %634 = vrot.lane.b32.xlu0 %v555_v54, %s1910_s26 }
 0xa9e   :  { %709 = vrot.lane.b32.xlu1 %v707_v55, %s1911_s27 }
 0xa9f   :  { %v2157_v58 = vsel %vm1339_vm5, %v1338_v57, %v1325_v56 }
 0xb0c   :  { %v631_v59 = vpop.permute.xlu1 %630 }
 0xb0f   :  { %v635_v60 = vpop.permute.xlu0 %634 }
 0xb10   :  { %v637_v61 = vsel %vm65_vm2, %v631_v59, %v635_v60  ;;  %v710_v62 = vpop.permute.xlu1 %709 }
 0xb11   :  { %v638_v63 = vpack.c.bf16 %v637_v61, %v637_v61  ;;  %1649 = vmatmul.mubr.msk.bf16.vlgmr.msra.gmra.mrb[12].mxu1 %vm65_vm2, %v710_v62 }
 0xb12   :  { %1653 = vmatpush3.bf16.msra.mxu1 %v1996_v23  ;;  %1660 = vmatprep.mubr.msk.bf16.mxu1 %vm1909_vm0, %v1908_v1 }
 0xb13   :  { %1641 = vmatmul.mubr.msk.bf16.vlgmr.msra.gmra.mrb[16].mxu0 %vm180_vm3, %v638_v63  ;;  %1654 = vmatprep.subr.bf16.mxu1 %v1908_v1 }
 0xb14   :  { %1665 = vmatpush3.bf16.msra.mxu0 %v1952_v0  ;;  %1668 = vmatprep.mubr.msk.bf16.mxu0 %vm1909_vm0, %v1908_v1 }
 0xb15   :  { %1666 = vmatprep.subr.bf16.mxu0 %v1908_v1 }
 0xb16   :  { %1655 = vmatpush3.bf16.msra.mxu1 %v2002_v24 }
 0xb17   :  { %1656 = vmatprep.subr.bf16.mxu1 %v1908_v1 }
 0xb18   :  { %1667 = vmatpush3.bf16.msra.mxu0 %v1960_v2 }
 0xb19   :  { %1672 = vmatprep.subr.bf16.mxu0 %v1908_v1 }
 0xb1a   :  { %1657 = vmatpush3.bf16.msra.mxu1 %v2009_v25 }
 0xb1b   :  { %1658 = vmatprep.subr.bf16.mxu1 %v1908_v1 }
 0xb1e   :  { %1659 = vmatpush3.bf16.msra.mxu1 %v2018_v27 }
 0xb1f   :  { %1684 = vmatprep.subr.bf16.mxu1 %v1908_v1 }
 0xbe4   :  { %v748_v3 = vpop.f32.mrb[12].mxu1 }
 0xbe5   :  { %v754_v4 = vadd.f32 %v748_v3, %v706_v18  ;;  %v1650_v5 = vpop.f32.mrb[13].mxu1 }
 0xbe6   :  { %v676_v6 = vpop.f32.mrb[16].mxu0  ;;  %v751_v7 = vpop.f32.mrb[14].mxu1 }
 0xbe7   :  { %1807 = vtanh.f32 %v754_v4  ;;  %v677_v8 = vadd.f32 %v676_v6, %v2049_v45  ;;  %v1642_v9 = vpop.f32.mrb[17].mxu0  ;;  %v1651_v10 = vpop.f32.mrb[15].mxu1  ;;  %v1478_v15 = vmul.f32 -1.442695, %v754_v4 }
 0xbe8   :  { %v679_v11 = vpop.f32.mrb[18].mxu0 }
 0xbe9   :  { %v1643_v12 = vpop.f32.mrb[19].mxu0  ;;  %1809 = vtanh.f32 %v677_v8  ;;  %v1476_v16 = vmul.f32 -1.442695, %v677_v8 }
 0xbea   :  { %1811 = vpow2.f32 %v1478_v15 }
 0xbeb   :  { %1813 = vpow2.f32 %v1476_v16 }
 0xbf1   :  { %v1808_v13 = vpop.eup %1807 }
 0xbf2   :  { %764 = vrot.lane.b32.xlu1 %v1808_v13, %s1910_s26 }
 0xbf3   :  { %v1810_v14 = vpop.eup %1809 }
 0xbf4   :  { %691 = vrot.lane.b32.xlu0 %v1810_v14, %s1910_s26  ;;  %v1812_v17 = vpop.eup %1811 }
 0xbf5   :  { %v1814_v19 = vpop.eup %1813  ;;  %v758_v20 = vadd.f32 1.0, %v1812_v17 }
 0xbf6   :  { %v685_v21 = vadd.f32 1.0, %v1814_v19 }
 0xbf7   :  { %1815 = vrcp.f32 %v758_v20 }
 0xbf8   :  { %1817 = vrcp.f32 %v685_v21 }
 0xc01   :  { %v1816_v22 = vpop.eup %1815 }
 0xc02   :  { %v1818_v29 = vpop.eup %1817  ;;  %v762_v32 = vmul.f32 %v1816_v22, %v2143_v43 }
 0xc03   :  { %v689_v35 = vmul.f32 %v1818_v29, %v2147_v47 }
 0xc64   :  { %v765_v26 = vpop.permute.xlu1 %764 }
 0xc65   :  { %v767_v28 = vmul.f32 %v1816_v22, %v765_v26 }
 0xc66   :  { %v692_v30 = vpop.permute.xlu0 %691 }
 0xc67   :  { %769 = vrot.lane.b32.xlu1 %v767_v28, %s1911_s27  ;;  %v694_v31 = vmul.f32 %v1818_v29, %v692_v30 }
 0xc69   :  { %696 = vrot.lane.b32.xlu0 %v694_v31, %s1911_s27 }
 0xcd9   :  { %v770_v33 = vpop.permute.xlu1 %769 }
 0xcda   :  { %v2187_v34 = vadd.f32 %v770_v33, %v762_v32 }
 0xcdb   :  { %v697_v36 = vpop.permute.xlu0 %696 }
 0xcdc   :  { %1819 = vtanh.f32 %v2187_v34  ;;  %v2191_v37 = vadd.f32 %v697_v36, %v689_v35 }
 0xcde   :  { %1821 = vtanh.f32 %v2191_v37 }
 0xce6   :  { %v1820_v38 = vpop.eup %1819 }
 0xce7   :  { %775 = vrot.lane.b32.xlu1 %v1820_v38, %s1910_s26 }
 0xce8   :  { %v1822_v39 = vpop.eup %1821 }
 0xce9   :  { %702 = vrot.lane.b32.xlu0 %v1822_v39, %s1910_s26 }
 0xd59   :  { %v776_v40 = vpop.permute.xlu1 %775 }
 0xd5a   :  { %v778_v41 = vmul.f32 %v1816_v22, %v776_v40 }
 0xd5b   :  { %v703_v42 = vpop.permute.xlu0 %702 }
 0xd5c   :  { %780 = vrot.lane.b32.xlu0 %v778_v41, %s1911_s27  ;;  %v705_v43 = vmul.f32 %v1818_v29, %v703_v42  ;;  %v857_v44 = vpack.c.bf16 %v778_v41, %v778_v41 }
 0xd5e   :  { %v1327_v46 = vrot.slane %v705_v43, 5  ;;  %784 = vrot.lane.b32.xlu1 %v705_v43, %s1910_s26 }
 0xd60   :  { %859 = vrot.lane.b32.xlu0 %v857_v44, %s1911_s27  ;;  %v2200_v47 = vsel %vm1341_vm6, %v2157_v58, %v1327_v46 }
 0xdce   :  { %v781_v48 = vpop.permute.xlu0 %780 }
 0xdd0   :  { %v785_v49 = vpop.permute.xlu1 %784 }
 0xdd1   :  { %v787_v50 = vsel %vm65_vm2, %v781_v48, %v785_v49 }
 0xdd2   :  { %v860_v51 = vpop.permute.xlu0 %859  ;;  %v788_v52 = vpack.c.bf16 %v787_v50, %v787_v50 }
 0xdd3   :  { %1669 = vmatmul.mubr.msk.bf16.vlgmr.msra.gmra.mrb[20].mxu0 %vm65_vm2, %v860_v51 }
 0xdd4   :  { %1673 = vmatpush3.bf16.msra.mxu0 %v1996_v23  ;;  %1680 = vmatprep.mubr.msk.bf16.mxu0 %vm1909_vm0, %v1908_v1 }
 0xdd5   :  { %1661 = vmatmul.mubr.msk.bf16.vlgmr.msra.gmra.mrb[16].mxu1 %vm180_vm3, %v788_v52  ;;  %1674 = vmatprep.subr.bf16.mxu0 %v1908_v1 }
 0xdd6   :  { %1685 = vmatpush3.bf16.msra.mxu1 %v1952_v0  ;;  %1688 = vmatprep.mubr.msk.bf16.mxu1 %vm1909_vm0, %v1908_v1 }
 0xdd7   :  { %1686 = vmatprep.subr.bf16.mxu1 %v1908_v1 }
 0xdd8   :  { %1675 = vmatpush3.bf16.msra.mxu0 %v2002_v24 }
 0xdd9   :  { %1676 = vmatprep.subr.bf16.mxu0 %v1908_v1 }
 0xdda   :  { %1687 = vmatpush3.bf16.msra.mxu1 %v1960_v2 }
 0xddb   :  { %1692 = vmatprep.subr.bf16.mxu1 %v1908_v1 }
 0xddc   :  { %1677 = vmatpush3.bf16.msra.mxu0 %v2009_v25 }
 0xddd   :  { %1678 = vmatprep.subr.bf16.mxu0 %v1908_v1 }
 0xde0   :  { %1679 = vmatpush3.bf16.msra.mxu0 %v2018_v27 }
 0xde1   :  { %1704 = vmatprep.subr.bf16.mxu0 %v1908_v1 }
 0xea6   :  { %v898_v54 = vpop.f32.mrb[20].mxu0 }
 0xea7   :  { %v904_v55 = vadd.f32 %v898_v54, %v856_v53  ;;  %v1670_v56 = vpop.f32.mrb[21].mxu0 }
 0xea8   :  { %v826_v57 = vpop.f32.mrb[16].mxu1  ;;  %v901_v58 = vpop.f32.mrb[22].mxu0 }
 0xea9   :  { %1823 = vtanh.f32 %v904_v55  ;;  %v827_v59 = vadd.f32 %v826_v57, %v2049_v45  ;;  %v1662_v60 = vpop.f32.mrb[17].mxu1  ;;  %v1671_v61 = vpop.f32.mrb[23].mxu0  ;;  %v1482_v4 = vmul.f32 -1.442695, %v904_v55 }
 0xeaa   :  { %v829_v62 = vpop.f32.mrb[18].mxu1 }
 0xeab   :  { %v1663_v63 = vpop.f32.mrb[19].mxu1  ;;  %1825 = vtanh.f32 %v827_v59  ;;  %v1480_v5 = vmul.f32 -1.442695, %v827_v59 }
 0xeac   :  { %1827 = vpow2.f32 %v1482_v4 }
 0xead   :  { %1829 = vpow2.f32 %v1480_v5 }
 0xeb3   :  { %v1824_v18 = vpop.eup %1823 }
 0xeb4   :  { %914 = vrot.lane.b32.xlu0 %v1824_v18, %s1910_s26 }
 0xeb5   :  { %v1826_v3 = vpop.eup %1825 }
 0xeb6   :  { %841 = vrot.lane.b32.xlu1 %v1826_v3, %s1910_s26  ;;  %v1828_v6 = vpop.eup %1827 }
 0xeb7   :  { %v1830_v7 = vpop.eup %1829  ;;  %v908_v8 = vadd.f32 1.0, %v1828_v6 }
 0xeb8   :  { %v835_v9 = vadd.f32 1.0, %v1830_v7 }
 0xeb9   :  { %1831 = vrcp.f32 %v908_v8 }
 0xeba   :  { %1833 = vrcp.f32 %v835_v9 }
 0xec3   :  { %v1832_v10 = vpop.eup %1831 }
 0xec4   :  { %v1834_v13 = vpop.eup %1833  ;;  %v912_v16 = vmul.f32 %v1832_v10, %v2187_v34 }
 0xec5   :  { %v839_v20 = vmul.f32 %v1834_v13, %v2191_v37 }
 0xf26   :  { %v915_v11 = vpop.permute.xlu0 %914 }
 0xf27   :  { %v917_v12 = vmul.f32 %v1832_v10, %v915_v11 }
 0xf28   :  { %v842_v14 = vpop.permute.xlu1 %841 }
 0xf29   :  { %919 = vrot.lane.b32.xlu0 %v917_v12, %s1911_s27  ;;  %v844_v15 = vmul.f32 %v1834_v13, %v842_v14 }
 0xf2b   :  { %846 = vrot.lane.b32.xlu1 %v844_v15, %s1911_s27 }
 0xf9b   :  { %v920_v17 = vpop.permute.xlu0 %919 }
 0xf9c   :  { %v2230_v19 = vadd.f32 %v920_v17, %v912_v16 }
 0xf9d   :  { %v847_v21 = vpop.permute.xlu1 %846 }
 0xf9e   :  { %1835 = vtanh.f32 %v2230_v19  ;;  %v2234_v22 = vadd.f32 %v847_v21, %v839_v20 }
 0xfa0   :  { %1837 = vtanh.f32 %v2234_v22 }
 0xfa8   :  { %v1836_v26 = vpop.eup %1835 }
 0xfa9   :  { %925 = vrot.lane.b32.xlu0 %v1836_v26, %s1910_s26 }
 0xfaa   :  { %v1838_v28 = vpop.eup %1837 }
 0xfab   :  { %852 = vrot.lane.b32.xlu1 %v1838_v28, %s1910_s26 }
0x101b   :  { %v926_v29 = vpop.permute.xlu0 %925 }
0x101c   :  { %v928_v30 = vmul.f32 %v1832_v10, %v926_v29 }
0x101d   :  { %v853_v31 = vpop.permute.xlu1 %852 }
0x101e   :  { %930 = vrot.lane.b32.xlu1 %v928_v30, %s1911_s27  ;;  %v855_v32 = vmul.f32 %v1834_v13, %v853_v31  ;;  %v1007_v33 = vpack.c.bf16 %v928_v30, %v928_v30 }
0x1020   :  { %v1329_v34 = vrot.slane %v855_v32, 4  ;;  %934 = vrot.lane.b32.xlu0 %v855_v32, %s1910_s26 }
0x1022   :  { %1009 = vrot.lane.b32.xlu1 %v1007_v33, %s1911_s27  ;;  %v2243_v35 = vsel %vm1343_vm7, %v2200_v47, %v1329_v34 }
0x1090   :  { %v931_v36 = vpop.permute.xlu1 %930 }
0x1092   :  { %v935_v37 = vpop.permute.xlu0 %934 }
0x1093   :  { %v937_v38 = vsel %vm65_vm2, %v931_v36, %v935_v37 }
0x1094   :  { %v1010_v39 = vpop.permute.xlu1 %1009  ;;  %v938_v40 = vpack.c.bf16 %v937_v38, %v937_v38 }
0x1095   :  { %1689 = vmatmul.mubr.msk.bf16.vlgmr.msra.gmra.mrb[20].mxu1 %vm65_vm2, %v1010_v39 }
0x1096   :  { %1693 = vmatpush3.bf16.msra.mxu1 %v1996_v23  ;;  %1700 = vmatprep.mubr.msk.bf16.mxu1 %vm1909_vm0, %v1908_v1 }
0x1097   :  { %1681 = vmatmul.mubr.msk.bf16.vlgmr.msra.gmra.mrb[24].mxu0 %vm180_vm3, %v938_v40  ;;  %1694 = vmatprep.subr.bf16.mxu1 %v1908_v1 }
0x1098   :  { %1705 = vmatpush3.bf16.msra.mxu0 %v1952_v0  ;;  %1708 = vmatprep.mubr.msk.bf16.mxu0 %vm1909_vm0, %v1908_v1  ;;  %v1006_v0 = vld [vmem:[%s2358_s0 + $0x6] sm:$0x1] }
0x1099   :  { %1706 = vmatprep.subr.bf16.mxu0 %v1908_v1 }
0x109a   :  { %1695 = vmatpush3.bf16.msra.mxu1 %v2002_v24 }
0x109b   :  { %1696 = vmatprep.subr.bf16.mxu1 %v1908_v1 }
0x109c   :  { %1707 = vmatpush3.bf16.msra.mxu0 %v1960_v2 }
0x109d   :  { %1712 = vmatprep.subr.bf16.mxu0 %v1908_v1 }
0x109e   :  { %1697 = vmatpush3.bf16.msra.mxu1 %v2009_v25 }
0x109f   :  { %1698 = vmatprep.subr.bf16.mxu1 %v1908_v1 }
0x10a2   :  { %1699 = vmatpush3.bf16.msra.mxu1 %v2018_v27 }
0x10a3   :  { %1724 = vmatprep.subr.bf16.mxu1 %v1908_v1 }
0x1168   :  { %v1048_v41 = vpop.f32.mrb[20].mxu1 }
0x1169   :  { %v1054_v42 = vadd.f32 %v1048_v41, %v1006_v0  ;;  %v1690_v43 = vpop.f32.mrb[21].mxu1 }
0x116a   :  { %v976_v44 = vpop.f32.mrb[24].mxu0  ;;  %v1051_v46 = vpop.f32.mrb[22].mxu1 }
0x116b   :  { %v977_v2 = vadd.f32 %v976_v44, %v2049_v45  ;;  %1839 = vtanh.f32 %v1054_v42  ;;  %v1682_v47 = vpop.f32.mrb[25].mxu0  ;;  %v1691_v48 = vpop.f32.mrb[23].mxu1  ;;  %v1486_v53 = vmul.f32 -1.442695, %v1054_v42 }
0x116c   :  { %v979_v49 = vpop.f32.mrb[26].mxu0 }
0x116d   :  { %1841 = vtanh.f32 %v977_v2  ;;  %v1683_v50 = vpop.f32.mrb[27].mxu0  ;;  %v1484_v54 = vmul.f32 -1.442695, %v977_v2 }
0x116e   :  { %1843 = vpow2.f32 %v1486_v53 }
0x116f   :  { %1845 = vpow2.f32 %v1484_v54 }
0x1175   :  { %v1840_v51 = vpop.eup %1839 }
0x1176   :  { %1064 = vrot.lane.b32.xlu1 %v1840_v51, %s1910_s26 }
0x1177   :  { %v1842_v52 = vpop.eup %1841 }
0x1178   :  { %991 = vrot.lane.b32.xlu0 %v1842_v52, %s1910_s26  ;;  %v1844_v55 = vpop.eup %1843 }
0x1179   :  { %v1846_v56 = vpop.eup %1845  ;;  %v1058_v57 = vadd.f32 1.0, %v1844_v55 }
0x117a   :  { %v985_v58 = vadd.f32 1.0, %v1846_v56 }
0x117b   :  { %1847 = vrcp.f32 %v1058_v57 }
0x117c   :  { %1849 = vrcp.f32 %v985_v58 }
0x1185   :  { %v1848_v59 = vpop.eup %1847 }
0x1186   :  { %v1850_v62 = vpop.eup %1849  ;;  %v1062_v3 = vmul.f32 %v1848_v59, %v2230_v19 }
0x1187   :  { %v989_v6 = vmul.f32 %v1850_v62, %v2234_v22 }
0x11e8   :  { %v1065_v60 = vpop.permute.xlu1 %1064 }
0x11e9   :  { %v1067_v61 = vmul.f32 %v1848_v59, %v1065_v60 }
0x11ea   :  { %v992_v63 = vpop.permute.xlu0 %991 }
0x11eb   :  { %v994_v18 = vmul.f32 %v1850_v62, %v992_v63  ;;  %1069 = vrot.lane.b32.xlu1 %v1067_v61, %s1911_s27 }
0x11ed   :  { %996 = vrot.lane.b32.xlu0 %v994_v18, %s1911_s27 }
0x125d   :  { %v1070_v4 = vpop.permute.xlu1 %1069 }
0x125e   :  { %v2273_v5 = vadd.f32 %v1070_v4, %v1062_v3  ;;  %v1883_v4 = vld [vmem:[%s2361_s3] sm:$0x1] }
0x125f   :  { %v997_v7 = vpop.permute.xlu0 %996 }
0x1260   :  { %1851 = vtanh.f32 %v2273_v5  ;;  %v2277_v8 = vadd.f32 %v997_v7, %v989_v6 }
0x1262   :  { %1853 = vtanh.f32 %v2277_v8 }
0x126a   :  { %v1852_v9 = vpop.eup %1851 }
0x126b   :  { %1075 = vrot.lane.b32.xlu1 %v1852_v9, %s1910_s26 }
0x126c   :  { %v1854_v10 = vpop.eup %1853 }
0x126d   :  { %1002 = vrot.lane.b32.xlu0 %v1854_v10, %s1910_s26 }
0x12dd   :  { %v1076_v11 = vpop.permute.xlu1 %1075 }
0x12de   :  { %v1078_v12 = vmul.f32 %v1848_v59, %v1076_v11 }
0x12df   :  { %v1003_v13 = vpop.permute.xlu0 %1002 }
0x12e0   :  { %v1005_v14 = vmul.f32 %v1850_v62, %v1003_v13  ;;  %1080 = vrot.lane.b32.xlu0 %v1078_v12, %s1911_s27  ;;  %v1157_v15 = vpack.c.bf16 %v1078_v12, %v1078_v12 }
0x12e2   :  { %v1331_v16 = vrot.slane %v1005_v14, 3  ;;  %1084 = vrot.lane.b32.xlu1 %v1005_v14, %s1910_s26 }
0x12e4   :  { %v2285_v17 = vsel %vm1345_vm8, %v2243_v35, %v1331_v16  ;;  %1159 = vrot.lane.b32.xlu0 %v1157_v15, %s1911_s27 }
0x1352   :  { %v1081_v19 = vpop.permute.xlu0 %1080 }
0x1354   :  { %v1085_v20 = vpop.permute.xlu1 %1084 }
0x1355   :  { %v1087_v21 = vsel %vm65_vm2, %v1081_v19, %v1085_v20  ;;  %v1749_v20 = vld [vmem:[%s2362_s4] sm:$0xff]  }
0x1356   :  { %v1088_v22 = vpack.c.bf16 %v1087_v21, %v1087_v21  ;;  %v1160_v26 = vpop.permute.xlu0 %1159  ;;  %v1750_v21 = vld [vmem:[%s2362_s4 + $0x8] sm:$0xff]  }
0x1357   :  { %1709 = vmatmul.mubr.msk.bf16.vlgmr.msra.gmra.mrb[28].mxu0 %vm65_vm2, %v1160_v26 }
0x1358   :  { %1701 = vmatmul.mubr.msk.bf16.vlgmr.msra.gmra.mrb[24].mxu1 %vm180_vm3, %v1088_v22  ;;  %1713 = vmatpush3.bf16.msra.mxu0 %v1996_v23  ;;  %v1156_v23 = vld [vmem:[%s2358_s0 + $0x7] sm:$0x1] }
0x1359   :  { %1714 = vmatprep.subr.bf16.mxu0 %v1908_v1  ;;  %1720 = vmatprep.mubr.msk.bf16.mxu0 %vm1909_vm0, %v1908_v1 }
0x135a   :  { %1728 = vmatprep.mubr.msk.bf16.mxu1 %vm1909_vm0, %v1908_v1  ;;  %1725 = vmatpush3.bf16.msra.mxu1 %v1749_v20 }
0x135b   :  { %1726 = vmatprep.subr.bf16.mxu1 %v1908_v1 }
0x135c   :  { %1715 = vmatpush3.bf16.msra.mxu0 %v2002_v24 }
0x135d   :  { %1716 = vmatprep.subr.bf16.mxu0 %v1908_v1 }
0x135e   :  { %1727 = vmatpush3.bf16.msra.mxu1 %v1750_v21 }
0x1360   :  { %1717 = vmatpush3.bf16.msra.mxu0 %v2009_v25 }
0x1361   :  { %1718 = vmatprep.subr.bf16.mxu0 %v1908_v1  ;;  %v1493_v1 = vld [vmem:[%s2363_s5] ss:$0 sm:$0xff]  ;;  %s1913_s5 = smov [#allocation6]  }
0x1364   :  { %1719 = vmatpush3.bf16.msra.mxu0 %v2018_v27 }
0x142a   :  { %v1198_v28 = vpop.f32.mrb[28].mxu0 }
0x142b   :  { %v1126_v29 = vpop.f32.mrb[24].mxu1  ;;  %v1204_v30 = vadd.f32 %v1198_v28, %v1156_v23  ;;  %v1710_v31 = vpop.f32.mrb[29].mxu0 }
0x142c   :  { %v1127_v32 = vadd.f32 %v1126_v29, %v2049_v45  ;;  %v1702_v33 = vpop.f32.mrb[25].mxu1  ;;  %v1201_v24 = vpop.f32.mrb[30].mxu0 }
0x142d   :  { %1855 = vtanh.f32 %v1204_v30  ;;  %v1129_v34 = vpop.f32.mrb[26].mxu1  ;;  %v1711_v35 = vpop.f32.mrb[31].mxu0  ;;  %v1490_v27 = vmul.f32 -1.442695, %v1204_v30 }
0x142e   :  { %1857 = vtanh.f32 %v1127_v32  ;;  %v1703_v25 = vpop.f32.mrb[27].mxu1  ;;  %v1488_v38 = vmul.f32 -1.442695, %v1127_v32  ;;  %v1422_v32 = vlaneseq }
0x142f   :  { %1859 = vpow2.f32 %v1490_v27 }
0x1430   :  { %1861 = vpow2.f32 %v1488_v38  ;;  %v1423_v33 = vand.u32 127, %v1422_v32 }
0x1432   :  { %vm1424_vm11 = vcmp.lt.s32.totalorder %v1423_v33, 64 }
0x1437   :  { %v1856_v36 = vpop.eup %1855 }
0x1438   :  { %v1858_v37 = vpop.eup %1857  ;;  %1214 = vrot.lane.b32.xlu0 %v1856_v36, %s1910_s26 }
0x1439   :  { %1141 = vrot.lane.b32.xlu1 %v1858_v37, %s1910_s26  ;;  %v1860_v39 = vpop.eup %1859 }
0x143a   :  { %v1862_v40 = vpop.eup %1861  ;;  %v1208_v45 = vadd.f32 1.0, %v1860_v39 }
0x143b   :  { %v1135_v0 = vadd.f32 1.0, %v1862_v40 }
0x143c   :  { %1863 = vrcp.f32 %v1208_v45 }
0x143d   :  { %1865 = vrcp.f32 %v1135_v0 }
0x1446   :  { %v1864_v41 = vpop.eup %1863 }
0x1447   :  { %v1866_v43 = vpop.eup %1865  ;;  %v1212_v47 = vmul.f32 %v1864_v41, %v2273_v5 }
0x1448   :  { %v1139_v48 = vmul.f32 %v1866_v43, %v2277_v8 }
0x14aa   :  { %v1215_v42 = vpop.permute.xlu0 %1214 }
0x14ab   :  { %v1142_v44 = vpop.permute.xlu1 %1141  ;;  %v1217_v46 = vmul.f32 %v1864_v41, %v1215_v42 }
0x14ac   :  { %v1144_v2 = vmul.f32 %v1866_v43, %v1142_v44 }
0x14ad   :  { %1219 = vrot.lane.b32.xlu0 %v1217_v46, %s1911_s27 }
0x14ae   :  { %1146 = vrot.lane.b32.xlu1 %v1144_v2, %s1911_s27 }
0x151f   :  { %v1220_v49 = vpop.permute.xlu0 %1219 }
0x1520   :  { %v1147_v50 = vpop.permute.xlu1 %1146  ;;  %v2312_v51 = vadd.f32 %v1220_v49, %v1212_v47 }
0x1521   :  { %v1149_v52 = vadd.f32 %v1147_v50, %v1139_v48 }
0x1522   :  { %1867 = vtanh.f32 %v2312_v51 }
0x1523   :  { %1869 = vtanh.f32 %v1149_v52 }
0x152c   :  { %v1868_v53 = vpop.eup %1867 }
0x152d   :  { %v1870_v54 = vpop.eup %1869  ;;  %1225 = vrot.lane.b32.xlu0 %v1868_v53, %s1910_s26 }
0x152e   :  { %1152 = vrot.lane.b32.xlu1 %v1870_v54, %s1910_s26 }
0x159f   :  { %v1226_v55 = vpop.permute.xlu0 %1225 }
0x15a0   :  { %v1153_v56 = vpop.permute.xlu1 %1152  ;;  %v1228_v57 = vmul.f32 %v1864_v41, %v1226_v55 }
0x15a1   :  { %v1155_v58 = vmul.f32 %v1866_v43, %v1153_v56 }
0x15a2   :  { %1230 = vrot.lane.b32.xlu1 %v1228_v57, %s1911_s27 }
0x15a3   :  { %v1333_v59 = vrot.slane %v1155_v58, 2  ;;  %1234 = vrot.lane.b32.xlu0 %v1155_v58, %s1910_s26 }
0x15a5   :  { %v1348_v60 = vsel %vm1347_vm9, %v2285_v17, %v1333_v59 }
0x1614   :  { %v1231_v61 = vpop.permute.xlu1 %1230 }
0x1615   :  { %v1235_v62 = vpop.permute.xlu0 %1234  ;;  %1307 = vst.msk [vmem:[#allocation2] sm:$0x1] %vm29_vm1, %v1231_v61 }
0x1616   :  { %v1237_v63 = vsel %vm65_vm2, %v1231_v61, %v1235_v62 }
0x1617   :  { %v1238_v18 = vpack.c.bf16 %v1237_v63, %v1237_v63 }
0x1619   :  { %1721 = vmatmul.mubr.msk.bf16.vlgmr.msra.gmra.mrb[32].mxu0 %vm180_vm3, %v1238_v18 }
0x16ec   :  { %v1276_v3 = vpop.f32.mrb[32].mxu0 }
0x16ed   :  { %v1277_v5 = vadd.f32 %v1883_v4, %v1276_v3  ;;  %v1722_v6 = vpop.f32.mrb[33].mxu0 }
0x16ee   :  { %v1279_v7 = vpop.f32.mrb[34].mxu0 }
0x16ef   :  { %1871 = vtanh.f32 %v1277_v5  ;;  %v1723_v8 = vpop.f32.mrb[35].mxu0  ;;  %v1492_v10 = vmul.f32 -1.442695, %v1277_v5 }
0x16f1   :  { %1873 = vpow2.f32 %v1492_v10 }
0x16f9   :  { %v1872_v9 = vpop.eup %1871 }
0x16fa   :  { %1291 = vrot.lane.b32.xlu1 %v1872_v9, %s1910_s26 }
0x16fb   :  { %v1874_v11 = vpop.eup %1873 }
0x16fc   :  { %v1285_v12 = vadd.f32 1.0, %v1874_v11 }
0x16fe   :  { %1875 = vrcp.f32 %v1285_v12 }
0x1708   :  { %v1876_v13 = vpop.eup %1875 }
0x1709   :  { %v1289_v16 = vmul.f32 %v1876_v13, %v1149_v52 }
0x176c   :  { %v1292_v14 = vpop.permute.xlu1 %1291 }
0x176d   :  { %v1294_v15 = vmul.f32 %v1876_v13, %v1292_v14 }
0x176f   :  { %1296 = vrot.lane.b32.xlu0 %v1294_v15, %s1911_s27 }
0x17e1   :  { %v1297_v17 = vpop.permute.xlu0 %1296 }
0x17e2   :  { %v1299_v19 = vadd.f32 %v1297_v17, %v1289_v16 }
0x17e4   :  { %1877 = vtanh.f32 %v1299_v19 }
0x17ee   :  { %v1878_v22 = vpop.eup %1877 }
0x17ef   :  { %1302 = vrot.lane.b32.xlu1 %v1878_v22, %s1910_s26  ;;  %s1912_s26 = smov 96  }
0x1861   :  { %v1303_v26 = vpop.permute.xlu1 %1302 }
0x1862   :  { %v1305_v23 = vmul.f32 %v1876_v13, %v1303_v26 }
0x1864   :  { %v1335_v28 = vrot.slane %v1305_v23, 1 }
0x1866   :  { %v1350_v29 = vsel %vm1349_vm10, %v1348_v60, %v1335_v28 }
0x1867   :  { %v1351_v30 = vpack.c.bf16 %v1350_v29, %v1350_v29 }
0x1869   :  { %1364 = vrot.lane.b32.xlu0 %v1351_v30, %s1911_s27 }
0x18db   :  { %v1365_v31 = vpop.permute.xlu0 %1364 }
0x18dc   :  { %1729 = vmatmul.mubr.msk.bf16.vlgmr.msra.gmra.mrb[28].mxu1 %vm65_vm2, %v1365_v31 }
0x19af   :  { %v1415_v24 = vpop.f32.mrb[28].mxu1 }
0x19b0   :  { %v1416_v34 = vadd.f32 %v1493_v1, %v1415_v24  ;;  %v1730_v35 = vpop.f32.mrb[29].mxu1 }
0x19b1   :  { %v1418_v25 = vpop.f32.mrb[30].mxu1 }
0x19b2   :  { %v1421_v36 = vmax.f32 %v1416_v34, 0.0  ;;  %v1731_v37 = vpop.f32.mrb[31].mxu1 }
0x19b4   :  { %v1425_v27 = vsel %vm1424_vm11, %v1421_v36, -1e+30 }
0x19b5   :  { %1426 = vmax.xlane.f32.xlu1 %v1425_v27 }
0x19c6   :  { %1314 = vrot.lane.b32.xlu1 %v1305_v23, %s1911_s27  ;;  %s1444_s27 = sshll.u32 %s1913_s5, 4  ;;  %s1445_s27 = int_to_ptr.vmem [resolvable:$true] %s1444_s27 }
0x19c7   :  { %s1884_s9 = scalar_lea.vmem %s1445_s27, 128  ;;  %p1889_p1 = scmp.lt.s32.totalorder %s1445_s27, %s1445_s27 }
0x19c8   :  { %p1885_p0 = scmp.ne.s32.totalorder %s1445_s27, %s1884_s9  ;;  %p1890_p2 = scmp.lt.s32.totalorder %s1884_s9, %s1884_s9 }
0x19ca   :  { %1319 = vrot.lane.b32.xlu1 %v1299_v19, %s1912_s26  ;;  %p1891_p3 = por %p1890_p2, %p1889_p1 }
0x19cc   :  { %p1892_p4 = pnand %p1891_p3, %p1885_p0 }
0x1a42   :  { %v1427_v38 = vpop.xlane.xlu1 %1426 }
0x1a43   :  { %v1428_v39 = vsub.f32 %v1425_v27, %v1427_v38 }
0x1a45   :  { %v1429_v40 = vmul.f32 1.442695, %v1428_v39 }
0x1a46   :  { %v1315_v45 = vpop.permute.xlu1 %1314 }
0x1a47   :  { %1879 = vpow2.f32 %v1429_v40  ;;  %1317 = vst.msk [vmem:[#allocation4] sm:$0x1] %vm29_vm1, %v1315_v45 }
0x1a4a   :  { %v1320_v0 = vpop.permute.xlu1 %1319 }
0x1a4b   :  { %1322 = vst.msk [vmem:[#allocation5] sm:$0x1] %vm29_vm1, %v1320_v0 }
0x1a51   :  { %v1880_v41 = vpop.eup %1879 }
0x1a52   :  { %1431 = vadd.xlane.f32.xlu0 %v1880_v41 }
0x1a68   :  { %1309 = vrot.lane.b32.xlu0 %v2312_v51, %s1912_s26 }
0x1adf   :  { %v1432_v42 = vpop.xlane.xlu0 %1431 }
0x1ae0   :  { %1881 = vlog2.f32 %v1432_v42 }
0x1ae3   :  { %v1310_v43 = vpop.permute.xlu0 %1309 }
0x1ae4   :  { %1312 = vst.msk [vmem:[#allocation3] sm:$0x1] %vm29_vm1, %v1310_v43 }
0x1aea   :  { %v1882_v44 = vpop.eup %1881 }
0x1aeb   :  { %v1434_v46 = vmul.f32 0.6931472, %v1882_v44 }
0x1aed   :  { %v1435_v2 = vadd.f32 %v1434_v46, %v1427_v38 }
0x1aef   :  { %v1436_v47 = vsub.f32 %v1425_v27, %v1435_v2 }
0x1af1   :  { %1437 = vst [vmem:[#allocation6] sm:$0xff] %v1436_v47 }
0x1af2   :  { %1895 = shalt.err (!%p1892_p4)
}
0x1af3   :  { %s1896_s2 = scalar_lea.hbm %s2364_s6, 128 }
0x1af4   :  { %p1897_p5 = scmp.ne.s32.totalorder %s2364_s6, %s1896_s2  ;;  %p1900_p6 = scmp.lt.u32.totalorder %s1896_s2, %s2364_s6 }
0x1af6   :  { %p1902_p7 = pnand %p1900_p6, %p1897_p5 }
0x1af8   :  { %1905 = shalt.err (!%p1902_p7)
}
0x1af9   :  { %1447 = dma.vmem_to_hbm [thread:$0]  %s1445_s27, 128, %s2364_s6, [#allocation7]  }
0x1afa   :  { %1906 = dma.done.wait [#allocation7], 128  }
0x1afb   :  { %1907 = vsyncadd [#allocation7], 4294967168 }
0x1afc   :  { %1451 = vsyncpa [#allocation7], 1 }

</bundles_post_ra>
